<compile_context>
chip_gen: v6e
topology: v6e:2x2x1
jax: 0.10.0
libtpu: 0.0.40
codegen_flags: <defaults>
</compile_context>

<pallas_src>
import jax
import jax.numpy as jnp
import numpy as np
from jax.experimental import pallas as pl
from jax.experimental.pallas import tpu as pltpu


def _round_up(x, m):
    return (x + m - 1) // m * m


def _vmem_budget():
    """(vmem_limit_bytes, hwi_tile_cap) sized to the local chip's VMEM.

    v5e / v6e have 128 MiB VMEM per TensorCore; v7x only 64 MiB, so request a
    budget that actually closes instead of all of physical VMEM.
    """
    try:
        kind = jax.devices()[0].device_kind.lower()
    except Exception:
        kind = ""
    if ("v5" in kind) or ("v6" in kind):
        return 100 * 1024 * 1024, 2048      # 128 MiB chips: bigger lane-dense tiles
    return 52 * 1024 * 1024, 1024           # v7x / unknown: leave headroom below 64 MiB


# --------------------------------------------------------------------------
# Kernel 1: query / sketch path (runs once per batch element).
# --------------------------------------------------------------------------
def _query_kernel(
    skT_ref,       # (1, 3*HWs_pad, C)  raw queries, transposed + spatially concat (f32)
    ws1t_ref,      # (C, C)  theta_sketch[0].weight^T with BN scale folded (compute dtype)
    bs1_ref,       # (1, C)  folded conv bias + BN shift (f32)
    ws2t_ref,      # (C, C)  theta_sketch[3].weight^T (compute dtype)
    wf1t_ref,      # (C, C)  sketch_fusion weight block 1^T (f32)
    wf2t_ref,      # (C, C)
    wf3t_ref,      # (C, C)
    op_ref,        # (2,) SMEM: [op.weight, op.bias]
    cumT_out,      # (1, HWs_pad, C)  comulative_query^T (f32)
    fusT_out,      # (1, HWs_pad, C)  sketch_fusion output^T (f32)
    max_out,       # (1, 8, C)        op_w-scaled per-channel spatial maxes (f32)
):
    cdt = ws1t_ref.dtype
    hws = cumT_out.shape[1]
    C = cumT_out.shape[2]

    skT = skT_ref[0]                                    # (3*hws, C) f32
    sk1 = skT[0 * hws:1 * hws]
    sk2 = skT[1 * hws:2 * hws]
    sk3 = skT[2 * hws:3 * hws]

    # comulative_query / sketch_fusion stay in f32 (one-shot, not MXU-bound).
    cumT_out[0] = jnp.maximum(jnp.maximum(sk1, sk2), sk3)
    fusT_out[0] = (
        jnp.dot(sk1, wf1t_ref[...], preferred_element_type=jnp.float32)
        + jnp.dot(sk2, wf2t_ref[...], preferred_element_type=jnp.float32)
        + jnp.dot(sk3, wf3t_ref[...], preferred_element_type=jnp.float32))

    # theta_sketch on all three queries in one wide matmul pair (bias/BN folded).
    h = jnp.dot(skT.astype(cdt), ws1t_ref[...],
                preferred_element_type=jnp.float32) + bs1_ref[...]
    h = jnp.maximum(h, 0.0)
    tsT = jnp.dot(h.astype(cdt), ws2t_ref[...],
                  preferred_element_type=jnp.float32)   # (3*hws, C)

    m1 = jnp.max(tsT[0 * hws:1 * hws], axis=0, keepdims=True)   # (1, C)
    m2 = jnp.max(tsT[1 * hws:2 * hws], axis=0, keepdims=True)
    m3 = jnp.max(tsT[2 * hws:3 * hws], axis=0, keepdims=True)

    op_w = op_ref[0]
    # rows 0..2: op_w * m_i          -> image kernel only adds op.bias
    # row  3  : (op_w/768)*(m1+m2+m3) -> mean-over-3-maps / 256 comes out of the
    #                                    already-8-sublane maps matmul for free.
    max_out[0] = jnp.concatenate(
        [op_w * m1, op_w * m2, op_w * m3,
         (op_w / 768.0) * (m1 + m2 + m3),
         jnp.zeros((4, C), jnp.float32)], axis=0)


# --------------------------------------------------------------------------
# Kernel 2: image path (gridded over batch x spatial tiles, both parallel).
# --------------------------------------------------------------------------
def _image_kernel(
    img_ref,       # (1, C, T)   detect_feat tile (compute dtype)
    wstk_ref,      # (3C, C)     [wi1' (BN folded); wproj[:, :C]; wproj[:, C:]]
    bi1_ref,       # (C, 1)      folded theta_image bias (f32)
    wi2_ref,       # (C, C)      theta_image[3].weight (compute dtype)
    max_ref,       # (1, 8, C)   op_w-scaled per-channel query maxes (f32)
    op_ref,        # (2,) SMEM:  [op.weight, op.bias]
    proj_out,      # (1, C, T)   projection(cat([attention_feats, detect_feat]))
    maps_out,      # (1, 8, T)   final_atten_map (rows 0..2 valid)
):
    cdt = img_ref.dtype
    C = img_ref.shape[1]

    img = img_ref[0]                                    # (C, T)

    # One MXU launch for theta_image conv1 and both projection halves.
    stk = jnp.dot(wstk_ref[...], img,
                  preferred_element_type=jnp.float32)   # (3C, T)
    h = jnp.maximum(stk[0 * C:1 * C] + bi1_ref[...], 0.0)
    pa = stk[1 * C:2 * C]
    pb = stk[2 * C:3 * C]

    timg = jnp.dot(wi2_ref[...], h.astype(cdt),
                   preferred_element_type=jnp.float32)  # (C, T) f32

    # All three attention maps + the mean/256 row in one 8-sublane f32 matmul
    # (no per-tile timg / maxes casts; negligible MXU cost).
    maps_raw = jnp.dot(max_ref[0], timg,
                       preferred_element_type=jnp.float32)   # (8, T)

    op_b = op_ref[1]
    maps_out[0] = maps_raw + op_b                       # rows 0..2 = self.op(maps)
    mean_map = maps_raw[3:4] + op_b / 256.0             # (1, T) = mean(maps)/256

    # projection(cat([image*mean_map, image], 1)) without the channel concat.
    proj_out[0] = pa * mean_map + pb


# --------------------------------------------------------------------------
# Parameter preparation (done ONCE, outside the per-call forward).
# --------------------------------------------------------------------------
def prepare_params(params, *, use_bf16=True):
    """Fold BN/bias into the first convs, split channel-concat weights, stack the
    image-side matrices and cast MXU operands to the compute dtype."""
    C = params["wi1"].shape[0]
    cdt = jnp.bfloat16 if use_bf16 else jnp.float32

    # theta_image: fold conv bias + BN affine into conv1.
    wi1f = params["bni_s"] * params["wi1"]                         # (C, C)
    bi1f = params["bni_s"] * params["bi1"] + params["bni_b"]       # (C, 1)
    # theta_sketch (transposed layout): column-scale by the BN scale.
    ws1tf = params["ws1"].T * params["bns_s"].reshape(1, C)        # (C, C)
    bs1f = (params["bns_s"] * params["bs1"] + params["bns_b"]).reshape(1, C)

    wproj, wfus = params["wproj"], params["wfus"]
    wstack = jnp.concatenate([wi1f, wproj[:, :C], wproj[:, C:]], axis=0)  # (3C, C)

    return dict(
        C=C, cdt=cdt,
        # image call
        wstack=wstack.astype(cdt),
        bi1=bi1f.astype(jnp.float32),
        wi2=params["wi2"].astype(cdt),
        # query call
        ws1t=ws1tf.astype(cdt),
        bs1=bs1f.astype(jnp.float32),
        ws2t=params["ws2"].T.astype(cdt),
        wf1t=wfus[:, :C].T.astype(jnp.float32),
        wf2t=wfus[:, C:2 * C].T.astype(jnp.float32),
        wf3t=wfus[:, 2 * C:].T.astype(jnp.float32),
        op=params["op"].astype(jnp.float32),
    )


# --------------------------------------------------------------------------
# Forward wrapper.
# --------------------------------------------------------------------------
def fusion_attention_forward(img, sk1, sk2, sk3, prep, *, hwi_tile=None):
    """img: (B, C, Hi, Wi); sk*: (B, C, Hs, Ws); float32 NCHW. `prep` from prepare_params."""
    B, C, Hi, Wi = img.shape
    _, _, Hs, Ws = sk1.shape
    HWi, HWs = Hi * Wi, Hs * Ws
    assert C == prep["C"]
    cdt = prep["cdt"]

    vmem_limit, tile_cap = _vmem_budget()
    if hwi_tile is None:
        hwi_tile = min(_round_up(HWi, 128), tile_cap)
    hwi_tile = _round_up(hwi_tile, 128)
    HWi_pad = _round_up(HWi, hwi_tile)
    HWs_pad = _round_up(HWs, 128)
    n_tiles = HWi_pad // hwi_tile

    # ---------------- query / sketch call: grid over batch only ----------------
    # Queries go in (spatial, channel) layout so the per-channel spatial max lands
    # as a (1, C) row; edge-replication padding keeps the spatial max unchanged.
    # Kept in f32 so comulative_query / sketch_fusion suffer no bf16 loss.
    def prep_query(x):
        xf = jnp.pad(x.reshape(B, C, HWs),
                     ((0, 0), (0, 0), (0, HWs_pad - HWs)), mode="edge")
        return jnp.transpose(xf, (0, 2, 1))                 # (B, HWs_pad, C)

    skT_all = jnp.concatenate(
        [prep_query(sk1), prep_query(sk2), prep_query(sk3)], axis=1
    ).astype(jnp.float32)

    def qconst(shape):
        # constant index map -> single-buffer (no overlap to gain, half the VMEM)
        return pl.BlockSpec(shape, lambda b: (0, 0), pipeline_mode=pl.Buffered(1))

    q_in_specs = [
        pl.BlockSpec((1, 3 * HWs_pad, C), lambda b: (b, 0, 0)),   # queries (per-b)
        qconst((C, C)), qconst((1, C)), qconst((C, C)),           # theta_sketch
        qconst((C, C)), qconst((C, C)), qconst((C, C)),           # sketch_fusion
        pl.BlockSpec(memory_space=pltpu.MemorySpace.SMEM),        # op scalars
    ]
    q_out_specs = (
        pl.BlockSpec((1, HWs_pad, C), lambda b: (b, 0, 0)),       # comulative_query^T
        pl.BlockSpec((1, HWs_pad, C), lambda b: (b, 0, 0)),       # sketch_fusion^T
        pl.BlockSpec((1, 8, C), lambda b: (b, 0, 0)),             # scaled query maxes
    )
    q_out_shape = (
        jax.ShapeDtypeStruct((B, HWs_pad, C), jnp.float32),
        jax.ShapeDtypeStruct((B, HWs_pad, C), jnp.float32),
        jax.ShapeDtypeStruct((B, 8, C), jnp.float32),
    )

    cumT, fusT, maxes = pl.pallas_call(
        _query_kernel,
        out_shape=q_out_shape,
        grid_spec=pltpu.PrefetchScalarGridSpec(
            num_scalar_prefetch=0, grid=(B,),
            in_specs=q_in_specs, out_specs=q_out_specs),
        compiler_params=pltpu.CompilerParams(
            dimension_semantics=("parallel",),
            vmem_limit_bytes=vmem_limit),
    )(skT_all, prep["ws1t"], prep["bs1"], prep["ws2t"],
      prep["wf1t"], prep["wf2t"], prep["wf3t"], prep["op"])

    # ---------------- image call: grid over (batch, spatial tiles) -------------
    img_f = jnp.pad(img.reshape(B, C, HWi),
                    ((0, 0), (0, 0), (0, HWi_pad - HWi))).astype(cdt)

    def iconst(shape):
        return pl.BlockSpec(shape, lambda b, j: (0, 0), pipeline_mode=pl.Buffered(1))

    i_in_specs = [
        pl.BlockSpec((1, C, hwi_tile), lambda b, j: (b, 0, j)),   # image tile
        iconst((3 * C, C)),                                       # stacked wi1'/wpa/wpb
        iconst((C, 1)),                                           # folded bias
        iconst((C, C)),                                           # wi2
        pl.BlockSpec((1, 8, C), lambda b, j: (b, 0, 0)),          # query maxes (per-b)
        pl.BlockSpec(memory_space=pltpu.MemorySpace.SMEM),        # op scalars
    ]
    i_out_specs = (
        pl.BlockSpec((1, C, hwi_tile), lambda b, j: (b, 0, j)),   # projected act_feat
        pl.BlockSpec((1, 8, hwi_tile), lambda b, j: (b, 0, j)),   # final_atten_map
    )
    i_out_shape = (
        # NOTE: on v5e (lowest HBM BW) this could be emitted in bf16 if the
        #       downstream RPN consumer allows, halving the largest store stream.
        jax.ShapeDtypeStruct((B, C, HWi_pad), jnp.float32),
        jax.ShapeDtypeStruct((B, 8, HWi_pad), jnp.float32),
    )

    proj, maps = pl.pallas_call(
        _image_kernel,
        out_shape=i_out_shape,
        grid_spec=pltpu.PrefetchScalarGridSpec(
            num_scalar_prefetch=0, grid=(B, n_tiles),
            in_specs=i_in_specs, out_specs=i_out_specs),
        compiler_params=pltpu.CompilerParams(
            # No cross-iteration state left in this call -> both axes parallel
            # (megacore-shardable even at B=1 on v7x).
            dimension_semantics=("parallel", "parallel"),
            vmem_limit_bytes=vmem_limit),
    )(img_f, prep["wstack"], prep["bi1"], prep["wi2"], maxes, prep["op"])

    cum = jnp.transpose(cumT, (0, 2, 1))[:, :, :HWs]
    fus = jnp.transpose(fusT, (0, 2, 1))[:, :, :HWs]
    return (
        proj[:, :, :HWi].reshape(B, C, Hi, Wi),
        cum.reshape(B, C, Hs, Ws),
        maps[:, :3, :HWi].reshape(B, 3, Hi, Wi),
        fus.reshape(B, C, Hs, Ws),
    )


# --------------------------------------------------------------------------
# Pure-JAX reference of the same math (PyTorch semantics, unfolded BN).
# --------------------------------------------------------------------------
def _reference(img, sk1, sk2, sk3, params):
    B, C, Hi, Wi = img.shape
    _, _, Hs, Ws = sk1.shape
    img_f = img.reshape(B, C, -1)
    s = [x.reshape(B, C, -1) for x in (sk1, sk2, sk3)]

    def theta(x, w1, b1, sc, sh, w2):
        h = jnp.einsum("oc,bcl->bol", w1, x) + b1[None]
        h = h * sc[None] + sh[None]
        h = jnp.maximum(h, 0.0)
        return jnp.einsum("oc,bcl->bol", w2, h)

    timg = theta(img_f, params["wi1"], params["bi1"], params["bni_s"],
                 params["bni_b"], params["wi2"])
    ts = [theta(x, params["ws1"], params["bs1"], params["bns_s"],
                params["bns_b"], params["ws2"]) for x in s]
    op_w, op_b = params["op"][0], params["op"][1]
    maps = []
    for t in ts:
        m = jnp.max(t, axis=2)                                 # (B, C)
        a = jnp.einsum("bc,bcl->bl", m, timg)[:, None, :]      # (B, 1, HWi)
        maps.append(op_w * a + op_b)
    maps = jnp.concatenate(maps, axis=1)                       # (B, 3, HWi)
    mean_map = jnp.mean(maps, axis=1, keepdims=True) / 256.0
    att = img_f * mean_map
    act = jnp.concatenate([att, img_f], axis=1)                # (B, 2C, HWi)
    proj = jnp.einsum("oc,bcl->bol", params["wproj"], act)
    cum = jnp.maximum(jnp.maximum(s[0], s[1]), s[2])
    fus = jnp.einsum("oc,bcl->bol", params["wfus"],
                     jnp.concatenate(s, axis=1))
    return (proj.reshape(B, C, Hi, Wi), cum.reshape(B, C, Hs, Ws),
            maps.reshape(B, 3, Hi, Wi), fus.reshape(B, C, Hs, Ws))


def make_params(key, C):
    ks = jax.random.split(key, 12)

    def xavier(k, shape):
        fan_out, fan_in = shape[0], shape[1]
        lim = float(np.sqrt(6.0 / (fan_in + fan_out)))
        return jax.random.uniform(k, shape, jnp.float32, -lim, lim)

    # BatchNorm in eval mode reduced to per-channel affine scale/shift
    # (nontrivial values so the weight-folding path is actually exercised).
    def bn_affine(k):
        ka, kb = jax.random.split(k)
        scale = 1.0 + 0.1 * jax.random.normal(ka, (C, 1), jnp.float32)
        shift = 0.05 * jax.random.normal(kb, (C, 1), jnp.float32)
        return scale, shift

    bni_s, bni_b = bn_affine(ks[7])
    bns_s, bns_b = bn_affine(ks[8])

    return {
        "wi1": xavier(ks[0], (C, C)),
        "bi1": 0.1 * jax.random.normal(ks[9], (C, 1), jnp.float32),
        "bni_s": bni_s, "bni_b": bni_b,
        "wi2": 0.05 * jax.random.normal(ks[1], (C, C), jnp.float32),
        "ws1": xavier(ks[2], (C, C)),
        "bs1": 0.1 * jax.random.normal(ks[10], (C, 1), jnp.float32),
        "bns_s": bns_s, "bns_b": bns_b,
        "ws2": 0.05 * jax.random.normal(ks[3], (C, C), jnp.float32),
        "op": jnp.concatenate([xavier(ks[4], (1, 1)).reshape(1),
                               jnp.array([0.05], jnp.float32)]),
        "wfus": xavier(ks[5], (C, 3 * C)),
        "wproj": xavier(ks[6], (C, 2 * C)),
    }


if __name__ == "__main__":
    key = jax.random.PRNGKey(0)
    k_img, k_s1, k_s2, k_s3, k_par = jax.random.split(key, 5)

    B, C = 2, 8          # dout_base_model analog (small)
    Hi = Wi = 16         # detect feature spatial  -> HWi = 256 (2 tiles @ 128)
    Hs = Ws = 8          # query feature spatial   -> HWs = 64 (padded to 128)

    img = jax.random.normal(k_img, (B, C, Hi, Wi), jnp.float32)
    sk1 = jax.random.normal(k_s1, (B, C, Hs, Ws), jnp.float32)
    sk2 = jax.random.normal(k_s2, (B, C, Hs, Ws), jnp.float32)
    sk3 = jax.random.normal(k_s3, (B, C, Hs, Ws), jnp.float32)
    params = make_params(k_par, C)

    refs = _reference(img, sk1, sk2, sk3, params)

    # f32 matmul-operand path, two spatial tiles (exercises tiling + BN folding).
    prep32 = prepare_params(params, use_bf16=False)
    outs = fusion_attention_forward(img, sk1, sk2, sk3, prep32, hwi_tile=128)
    outs = jax.block_until_ready(outs)
    for o, r in zip(outs, refs):
        np.testing.assert_allclose(np.asarray(o), np.asarray(r),
                                   rtol=2e-4, atol=2e-4)

    # default bf16 matmul-operand path (f32 accumulation; f32 cum/fusion).
    prep16 = prepare_params(params)                   # use_bf16=True default
    outs16 = fusion_attention_forward(img, sk1, sk2, sk3, prep16, hwi_tile=256)
    outs16 = jax.block_until_ready(outs16)
    for o, r in zip(outs16, refs):
        np.testing.assert_allclose(np.asarray(o), np.asarray(r),
                                   rtol=5e-2, atol=5e-2)

    print("KERNEL_OK")
</pallas_src>

<mosaic_0001>
module attributes {stable_mosaic.version = 11 : i64} {
  func.func @_query_kernel(%arg0: i32, %arg1: memref<1x384x8xf32, #tpu.memory_space<vmem>>, %arg2: memref<8x8xf32, #tpu.memory_space<vmem>>, %arg3: memref<1x8xf32, #tpu.memory_space<vmem>>, %arg4: memref<8x8xf32, #tpu.memory_space<vmem>>, %arg5: memref<8x8xf32, #tpu.memory_space<vmem>>, %arg6: memref<8x8xf32, #tpu.memory_space<vmem>>, %arg7: memref<8x8xf32, #tpu.memory_space<vmem>>, %arg8: memref<2xf32, #tpu.memory_space<smem>>, %arg9: memref<1x128x8xf32, #tpu.memory_space<vmem>>, %arg10: memref<1x128x8xf32, #tpu.memory_space<vmem>>, %arg11: memref<1x8x8xf32, #tpu.memory_space<vmem>>) attributes {dimension_semantics = [#tpu.dimension_semantics<parallel>], iteration_bounds = array<i64: 2>, scalar_prefetch = 0 : i64, scratch_operands = 0 : i64, tpu.core_type = #tpu.core_type<tc>, window_params = [{transform_indices = @transform_0, window_bounds = array<i64: 1, 384, 8>}, {pipeline_mode = #tpu.pipeline_mode<synchronous>, transform_indices = @transform_1, window_bounds = array<i64: 8, 8>}, {pipeline_mode = #tpu.pipeline_mode<synchronous>, transform_indices = @transform_2, window_bounds = array<i64: 1, 8>}, {pipeline_mode = #tpu.pipeline_mode<synchronous>, transform_indices = @transform_3, window_bounds = array<i64: 8, 8>}, {pipeline_mode = #tpu.pipeline_mode<synchronous>, transform_indices = @transform_4, window_bounds = array<i64: 8, 8>}, {pipeline_mode = #tpu.pipeline_mode<synchronous>, transform_indices = @transform_5, window_bounds = array<i64: 8, 8>}, {pipeline_mode = #tpu.pipeline_mode<synchronous>, transform_indices = @transform_6, window_bounds = array<i64: 8, 8>}, {transform_indices = @transform_7, window_bounds = array<i64: 2>}, {transform_indices = @transform_8, window_bounds = array<i64: 1, 128, 8>}, {transform_indices = @transform_9, window_bounds = array<i64: 1, 128, 8>}, {transform_indices = @transform_10, window_bounds = array<i64: 1, 8, 8>}]} {
    %c0 = arith.constant 0 : index
    %c0_0 = arith.constant 0 : index
    %c0_1 = arith.constant 0 : index
    %0 = vector.load %arg1[%c0, %c0_0, %c0_1] : memref<1x384x8xf32, #tpu.memory_space<vmem>>, vector<1x384x8xf32>
    %1 = vector.shape_cast %0 : vector<1x384x8xf32> to vector<384x8xf32>
    %2 = vector.extract_strided_slice %1 {offsets = [0, 0], sizes = [128, 8], strides = [1, 1]} : vector<384x8xf32> to vector<128x8xf32>
    %3 = vector.extract_strided_slice %1 {offsets = [128, 0], sizes = [128, 8], strides = [1, 1]} : vector<384x8xf32> to vector<128x8xf32>
    %4 = vector.extract_strided_slice %1 {offsets = [256, 0], sizes = [128, 8], strides = [1, 1]} : vector<384x8xf32> to vector<128x8xf32>
    %5 = arith.maximumf %2, %3 : vector<128x8xf32>
    %6 = arith.maximumf %5, %4 : vector<128x8xf32>
    %c0_2 = arith.constant 0 : index
    %c0_3 = arith.constant 0 : index
    %c0_4 = arith.constant 0 : index
    %7 = vector.load %arg9[%c0_2, %c0_3, %c0_4] : memref<1x128x8xf32, #tpu.memory_space<vmem>>, vector<1x128x8xf32>
    %8 = vector.shape_cast %7 : vector<1x128x8xf32> to vector<128x8xf32>
    %9 = vector.shape_cast %6 : vector<128x8xf32> to vector<1x128x8xf32>
    tpu.vector_store %arg9[%c0_2, %c0_3, %c0_4], %9 {strides = array<i32>} : memref<1x128x8xf32, #tpu.memory_space<vmem>>, vector<1x128x8xf32>,
    %c0_5 = arith.constant 0 : index
    %c0_6 = arith.constant 0 : index
    %10 = vector.load %arg5[%c0_5, %c0_6] : memref<8x8xf32, #tpu.memory_space<vmem>>, vector<8x8xf32>
    %cst = arith.constant dense<0.000000e+00> : vector<128x8xf32>
    %11 = tpu.matmul %2, %10, %cst {dimension_numbers = #tpu.dot_dimension_numbers<[1], [0], [0], [1], [0, 0, 1, 1], [], []>} : vector<128x8xf32>, vector<8x8xf32>, vector<128x8xf32> -> vector<128x8xf32>
    %c0_7 = arith.constant 0 : index
    %c0_8 = arith.constant 0 : index
    %12 = vector.load %arg6[%c0_7, %c0_8] : memref<8x8xf32, #tpu.memory_space<vmem>>, vector<8x8xf32>
    %cst_9 = arith.constant dense<0.000000e+00> : vector<128x8xf32>
    %13 = tpu.matmul %3, %12, %cst_9 {dimension_numbers = #tpu.dot_dimension_numbers<[1], [0], [0], [1], [0, 0, 1, 1], [], []>} : vector<128x8xf32>, vector<8x8xf32>, vector<128x8xf32> -> vector<128x8xf32>
    %14 = arith.addf %11, %13 : vector<128x8xf32>
    %c0_10 = arith.constant 0 : index
    %c0_11 = arith.constant 0 : index
    %15 = vector.load %arg7[%c0_10, %c0_11] : memref<8x8xf32, #tpu.memory_space<vmem>>, vector<8x8xf32>
    %cst_12 = arith.constant dense<0.000000e+00> : vector<128x8xf32>
    %16 = tpu.matmul %4, %15, %cst_12 {dimension_numbers = #tpu.dot_dimension_numbers<[1], [0], [0], [1], [0, 0, 1, 1], [], []>} : vector<128x8xf32>, vector<8x8xf32>, vector<128x8xf32> -> vector<128x8xf32>
    %17 = arith.addf %14, %16 : vector<128x8xf32>
    %c0_13 = arith.constant 0 : index
    %c0_14 = arith.constant 0 : index
    %c0_15 = arith.constant 0 : index
    %18 = vector.load %arg10[%c0_13, %c0_14, %c0_15] : memref<1x128x8xf32, #tpu.memory_space<vmem>>, vector<1x128x8xf32>
    %19 = vector.shape_cast %18 : vector<1x128x8xf32> to vector<128x8xf32>
    %20 = vector.shape_cast %17 : vector<128x8xf32> to vector<1x128x8xf32>
    tpu.vector_store %arg10[%c0_13, %c0_14, %c0_15], %20 {strides = array<i32>} : memref<1x128x8xf32, #tpu.memory_space<vmem>>, vector<1x128x8xf32>,
    %c0_16 = arith.constant 0 : index
    %c0_17 = arith.constant 0 : index
    %21 = vector.load %arg2[%c0_16, %c0_17] : memref<8x8xf32, #tpu.memory_space<vmem>>, vector<8x8xf32>
    %cst_18 = arith.constant dense<0.000000e+00> : vector<384x8xf32>
    %22 = tpu.matmul %1, %21, %cst_18 {dimension_numbers = #tpu.dot_dimension_numbers<[1], [0], [0], [1], [0, 0, 1, 1], [], []>} : vector<384x8xf32>, vector<8x8xf32>, vector<384x8xf32> -> vector<384x8xf32>
    %c0_19 = arith.constant 0 : index
    %c0_20 = arith.constant 0 : index
    %23 = vector.load %arg3[%c0_19, %c0_20] : memref<1x8xf32, #tpu.memory_space<vmem>>, vector<1x8xf32>
    %24 = vector.broadcast %23 : vector<1x8xf32> to vector<384x8xf32>
    %25 = arith.addf %22, %24 : vector<384x8xf32>
    %cst_21 = arith.constant 0.000000e+00 : f32
    %26 = vector.broadcast %cst_21 : f32 to vector<384x8xf32>
    %27 = arith.maximumf %25, %26 : vector<384x8xf32>
    %c0_22 = arith.constant 0 : index
    %c0_23 = arith.constant 0 : index
    %28 = vector.load %arg4[%c0_22, %c0_23] : memref<8x8xf32, #tpu.memory_space<vmem>>, vector<8x8xf32>
    %cst_24 = arith.constant dense<0.000000e+00> : vector<384x8xf32>
    %29 = tpu.matmul %27, %28, %cst_24 {dimension_numbers = #tpu.dot_dimension_numbers<[1], [0], [0], [1], [0, 0, 1, 1], [], []>} : vector<384x8xf32>, vector<8x8xf32>, vector<384x8xf32> -> vector<384x8xf32>
    %30 = vector.extract_strided_slice %29 {offsets = [0, 0], sizes = [128, 8], strides = [1, 1]} : vector<384x8xf32> to vector<128x8xf32>
    %cst_25 = arith.constant dense<0xFF800000> : vector<8xf32>
    %31 = vector.multi_reduction <maximumf>, %30, %cst_25 [0] : vector<128x8xf32> to vector<8xf32>
    %32 = vector.shape_cast %31 : vector<8xf32> to vector<1x8xf32>
    %33 = vector.extract_strided_slice %29 {offsets = [128, 0], sizes = [128, 8], strides = [1, 1]} : vector<384x8xf32> to vector<128x8xf32>
    %cst_26 = arith.constant dense<0xFF800000> : vector<8xf32>
    %34 = vector.multi_reduction <maximumf>, %33, %cst_26 [0] : vector<128x8xf32> to vector<8xf32>
    %35 = vector.shape_cast %34 : vector<8xf32> to vector<1x8xf32>
    %36 = vector.extract_strided_slice %29 {offsets = [256, 0], sizes = [128, 8], strides = [1, 1]} : vector<384x8xf32> to vector<128x8xf32>
    %cst_27 = arith.constant dense<0xFF800000> : vector<8xf32>
    %37 = vector.multi_reduction <maximumf>, %36, %cst_27 [0] : vector<128x8xf32> to vector<8xf32>
    %38 = vector.shape_cast %37 : vector<8xf32> to vector<1x8xf32>
    %c0_28 = arith.constant 0 : index
    %39 = memref.load %arg8[%c0_28] : memref<2xf32, #tpu.memory_space<smem>>
    %40 = vector.broadcast %39 : f32 to vector<1x8xf32>
    %41 = arith.mulf %40, %32 : vector<1x8xf32>
    %42 = vector.broadcast %39 : f32 to vector<1x8xf32>
    %43 = arith.mulf %42, %35 : vector<1x8xf32>
    %44 = vector.broadcast %39 : f32 to vector<1x8xf32>
    %45 = arith.mulf %44, %38 : vector<1x8xf32>
    %cst_29 = arith.constant 7.680000e+02 : f32
    %46 = arith.divf %39, %cst_29 : f32
    %47 = arith.addf %32, %35 : vector<1x8xf32>
    %48 = arith.addf %47, %38 : vector<1x8xf32>
    %49 = vector.broadcast %46 : f32 to vector<1x8xf32>
    %50 = arith.mulf %49, %48 : vector<1x8xf32>
    %cst_30 = arith.constant 0.000000e+00 : f32
    %51 = vector.broadcast %cst_30 : f32 to vector<4x8xf32>
    %52 = tpu.concatenate %41, %43, %45, %50, %51 in 0 : vector<1x8xf32>, vector<1x8xf32>, vector<1x8xf32>, vector<1x8xf32>, vector<4x8xf32> -> vector<8x8xf32>
    %c0_31 = arith.constant 0 : index
    %c0_32 = arith.constant 0 : index
    %c0_33 = arith.constant 0 : index
    %53 = vector.load %arg11[%c0_31, %c0_32, %c0_33] : memref<1x8x8xf32, #tpu.memory_space<vmem>>, vector<1x8x8xf32>
    %54 = vector.shape_cast %53 : vector<1x8x8xf32> to vector<8x8xf32>
    %55 = vector.shape_cast %52 : vector<8x8xf32> to vector<1x8x8xf32>
    tpu.vector_store %arg11[%c0_31, %c0_32, %c0_33], %55 {strides = array<i32>} : memref<1x8x8xf32, #tpu.memory_space<vmem>>, vector<1x8x8xf32>,
    return
  }
  func.func @transform_0(%arg0: i32) -> (i32, i32, i32) {
    %c0_i32 = arith.constant 0 : i32
    %c0_i32_0 = arith.constant 0 : i32
    %c0_i32_1 = arith.constant 0 : i32
    return %arg0, %c0_i32, %c0_i32_0 : i32, i32, i32
  }
  func.func @transform_1(%arg0: i32) -> (i32, i32) {
    %c0_i32 = arith.constant 0 : i32
    %c0_i32_0 = arith.constant 0 : i32
    %c0_i32_1 = arith.constant 0 : i32
    return %c0_i32, %c0_i32_0 : i32, i32
  }
  func.func @transform_2(%arg0: i32) -> (i32, i32) {
    %c0_i32 = arith.constant 0 : i32
    %c0_i32_0 = arith.constant 0 : i32
    %c0_i32_1 = arith.constant 0 : i32
    return %c0_i32, %c0_i32_0 : i32, i32
  }
  func.func @transform_3(%arg0: i32) -> (i32, i32) {
    %c0_i32 = arith.constant 0 : i32
    %c0_i32_0 = arith.constant 0 : i32
    %c0_i32_1 = arith.constant 0 : i32
    return %c0_i32, %c0_i32_0 : i32, i32
  }
  func.func @transform_4(%arg0: i32) -> (i32, i32) {
    %c0_i32 = arith.constant 0 : i32
    %c0_i32_0 = arith.constant 0 : i32
    %c0_i32_1 = arith.constant 0 : i32
    return %c0_i32, %c0_i32_0 : i32, i32
  }
  func.func @transform_5(%arg0: i32) -> (i32, i32) {
    %c0_i32 = arith.constant 0 : i32
    %c0_i32_0 = arith.constant 0 : i32
    %c0_i32_1 = arith.constant 0 : i32
    return %c0_i32, %c0_i32_0 : i32, i32
  }
  func.func @transform_6(%arg0: i32) -> (i32, i32) {
    %c0_i32 = arith.constant 0 : i32
    %c0_i32_0 = arith.constant 0 : i32
    %c0_i32_1 = arith.constant 0 : i32
    return %c0_i32, %c0_i32_0 : i32, i32
  }
  func.func @transform_7(%arg0: i32) -> i32 {
    %c0_i32 = arith.constant 0 : i32
    %c0_i32_0 = arith.constant 0 : i32
    return %c0_i32 : i32
  }
  func.func @transform_8(%arg0: i32) -> (i32, i32, i32) {
    %c0_i32 = arith.constant 0 : i32
    %c0_i32_0 = arith.constant 0 : i32
    %c0_i32_1 = arith.constant 0 : i32
    return %arg0, %c0_i32, %c0_i32_0 : i32, i32, i32
  }
  func.func @transform_9(%arg0: i32) -> (i32, i32, i32) {
    %c0_i32 = arith.constant 0 : i32
    %c0_i32_0 = arith.constant 0 : i32
    %c0_i32_1 = arith.constant 0 : i32
    return %arg0, %c0_i32, %c0_i32_0 : i32, i32, i32
  }
  func.func @transform_10(%arg0: i32) -> (i32, i32, i32) {
    %c0_i32 = arith.constant 0 : i32
    %c0_i32_0 = arith.constant 0 : i32
    %c0_i32_1 = arith.constant 0 : i32
    return %arg0, %c0_i32, %c0_i32_0 : i32, i32, i32
  }
}

</mosaic_0001>

<bundles_post_ra>
// kernel: tpu_custom_call.1
= control target key start
LH: loop header
LB: loop body
LE: loop exit
PB: predicated region body
PF: predicated region fallthrough
CT: control target
= control target key end

     0   :  { %16 = vsyncpa [#allocation4], 0  ;;  %s3700_s0 = inlined_call_operand.vmem [shape: f32[2,384,8], index: 0, kind: input, shape index: {}]   ;;  %s3701_s1 = inlined_call_operand.vmem [shape: f32[8,8], index: 1, kind: input, shape index: {}]   ;;  %s3702_s2 = inlined_call_operand.vmem [shape: f32[1,8], index: 2, kind: input, shape index: {}]   ;;  %s3703_s3 = inlined_call_operand.vmem [shape: f32[8,8], index: 3, kind: input, shape index: {}]   ;;  %s3704_s4 = inlined_call_operand.vmem [shape: f32[8,8], index: 4, kind: input, shape index: {}]   ;;  %s3705_s5 = inlined_call_operand.vmem [shape: f32[8,8], index: 5, kind: input, shape index: {}]   ;;  %s3706_s6 = inlined_call_operand.vmem [shape: f32[8,8], index: 6, kind: input, shape index: {}]   ;;  %s3707_s7 = inlined_call_operand.vmem [shape: f32[2], index: 7, kind: input, shape index: {}]   ;;  %s3708_s8 = inlined_call_operand.vmem [shape: f32[2,128,8], index: 8, kind: output, shape index: {0}]   ;;  %s3709_s9 = inlined_call_operand.vmem [shape: f32[2,128,8], index: 9, kind: output, shape index: {1}]   ;;  %s3710_s10 = inlined_call_operand.hbm [shape: f32[2,8,8], index: 10, kind: output, shape index: {2}]  }
   0x1   :  { %17 = vsyncpa [#allocation3], 0 }
   0x2   :  { %19 = vsyncpa [#allocation3 + $0x1], 0  ;;  %s2931_s13 = smov 0   ;;  %s2933_s14 = smov 0  }
   0x3   :  { %s2935_s15 = smov 0   ;;  %s2937_s16 = smov 0  }
   0x4 LB: > { %s2952_s17 = sadd.s32 4294967295, %s2872_s16   ;;  %s2202_s18 = sadd.s32 4294967294, %s2872_s16   ;;  %s2872_s16 = sphi %s2937_s16, %s3717_s16   ;;  %s2868_s15 = sphi %s2935_s15, %s3716_s15   ;;  %s2864_s14 = sphi %s2933_s14, %s3715_s14   ;;  %s2860_s13 = sphi %s2931_s13, %s3714_s13  }
   0x5   : > { %s2956_s19 = sadd.s32 1, %s2872_s16   ;;  %s257_s20 = sadd.s32 1, %s2868_s15 }
   0x6   : > { %s254_s21 = ssub.s32 %s2872_s16, %s2956_s19  ;;  %p267_p0 = scmp.ne.s32.totalorder %s2868_s15, %s2864_s14 }
   0x7   : > { %p255_p1 = scmp.eq.s32.totalorder %s254_s21, 0  ;;  %p268_p2 = scmp.eq.s32.totalorder %s2952_s17, 1 }
   0x8   : > { %p273_p3 = scmp.ne.s32.totalorder %s2864_s14, %s2860_s13  ;;  %p274_p4 = scmp.eq.s32.totalorder %s2202_s18, 1 }
   0x9   : > { %s2967_s22 = scalar_select %p255_p1, %s2868_s15, %s257_s20  }
   0xa   : > { %p2969_p5 = por %p268_p2, %p267_p0  ;;  %p2973_p6 = por %p274_p4, %p273_p3 }
   0xb   : > { %p2203_p7 = scmp.ge.s32.totalorder %s2872_s16, 1  ;;  %p281_p8 = scmp.lt.s32.totalorder %s2872_s16, 3 }
   0xc   : > { %p2757_p9 = scmp.eq.s32.totalorder %s2952_s17, 0  ;;  %s312_s28 = sshll.u32 %s3707_s7, 4  ;;  %s313_s28 = int_to_ptr.vmem [resolvable:$true] %s312_s28 }
   0xd   : > { %p2980_p10 = pnand %p2203_p7, %p281_p8  ;;  %s2793_s29 = scalar_lea.vmem %s313_s28, 16 }
   0xe   : > { %p2794_p13 = scmp.ne.s32.totalorder %s313_s28, %s2793_s29  ;;  %p2801_p3 = scmp.lt.s32.totalorder %s313_s28, %s313_s28 }
   0xf   : > { %p2749_p11 = pneg %p2980_p10  ;;  %p2802_p4 = scmp.lt.s32.totalorder %s2793_s29, %s2793_s29 }
  0x11   : > { %p2750_p12 = pnand %p2757_p9, %p2749_p11  ;;  %p2803_p7 = por %p2802_p4, %p2801_p3 }
  0x13   : > { %p2795_p0 = pneg %p2750_p12 }
  0x15   : > { %p2796_p1 = pnand %p2795_p0, %p2794_p13 }
  0x17   : > { %p2797_p2 = pneg %p2796_p1 }
  0x19   : > { %p2804_p8 = pnand %p2803_p7, %p2797_p2 }
  0x1b   : > { %2807 = shalt.err (!%p2804_p8)
}
  0x1c   : > { %s2874_s30 = smov [#allocation2]   ;;  %333 = sbr.rel (%p2980_p10) target bundleno = 618 (0x26a), region = 52 }
  0x1d   : > { %2752 = dma.vmem_to_smem (!%p2750_p12), %s313_s28, 16, %s2874_s30, [#allocation4]  }
  0x21   : > { %2851 = dma.done.wait (%p2757_p9), [#allocation4], 16  }
  0x22   : > { %2853 = vsyncadd (%p2757_p9), [#allocation4], 4294967280 }
  0x23   : > { %339 = sfence }
  0x24   : > { %v495_v0 = vld [vmem:[%s3705_s5] sm:$0xff]  ;;  %p382_p11 = scmp.lt.s32.totalorder %s2952_s17, 1  ;;  %vm477_vm0 = vcmask 64512   ;;  %s379_s20 = sand.u32 1, %s2864_s14   ;;  %vm2042_vm1 = vcmask 1040384   ;;  %vm2044_vm2 = vcmask 1041408  }
  0x25   : > { %v494_v1 = vld [vmem:[%s3704_s4] sm:$0xff]  ;;  %2740 = vmatprep.subr.mxu1 %v495_v0  ;;  %2514 = vmatprep.subr.mxu0 %v495_v0  ;;  %s2208_s21 = sshll.u32 %s379_s20, 3  ;;  %vm2046_vm3 = vcmask 1042432   ;;  %vm2048_vm4 = vcmask 1043456   ;;  %s2062_s12 = scalar_lea.sflag [#allocation3], %s379_s20 }
  0x26   : > { %v882_v2 = vld [vmem:[%s3706_s6] sm:$0xff]  ;;  %2741 = vmatpush3.msra.mxu1 %v495_v0  ;;  %s3008_s26 = scalar_select %p382_p11, %s2952_s17, 1  ;;  %2515 = vmatpush3.msra.mxu0 %v495_v0 }
  0x27   : > { %2540 = vmatprep.subr.mxu1 %v494_v1  ;;  %2566 = vmatprep.subr.mxu0 %v882_v2  ;;  %v3038_v8 = vld [vmem:[%s3701_s1] sm:$0xff]  ;;  %s381_s28 = scalar_lea.vmem [#allocation5], %s2208_s21 }
  0x28   : > { %s2742_s27 = smul.u32 384, %s3008_s26  ;;  %s2363_s18 = sshll.u32 %s3008_s26, 7 }
  0x29   : > { %s3058_s25 = scalar_lea.vmem %s3708_s8, %s2363_s18  ;;  %s3462_s11 = scalar_lea.vmem %s3709_s9, %s2363_s18 }
  0x2a   : > { %s3014_s30 = scalar_lea.vmem %s3700_s0, %s2742_s27  ;;  %s2030_s18 = sld [smem:[#allocation2]] }
  0x2b   : > { %v3017_v3 = vld [vmem:[%s3014_s30 + $0xc0] sm:$0xff]  ;;  %v3020_v4 = vld [vmem:[%s3014_s30 + $0xc8] sm:$0xff]  ;;  %v3048_v10 = vld [vmem:[%s3014_s30 + $0xd0] sm:$0xff]  ;;  %s2360_s27 = sshll.u32 %s2952_s17, 7  ;;  %s2081_s29 = sshll.u32 %s381_s28, 4  ;;  %s2082_s29 = int_to_ptr.vmem [resolvable:$true] %s2081_s29 }
  0x2c   : > { %v3023_v5 = vld [vmem:[%s3014_s30 + $0x80] sm:$0xff]  ;;  %2528 = vmatprep.mubr.msk.f32.mxu1 %vm477_vm0, %v3017_v3  ;;  %v3030_v6 = vld [vmem:[%s3014_s30 + $0x8] sm:$0xff]  ;;  %v3051_v11 = vld [vmem:[%s3014_s30 + $0x90] sm:$0xff]  ;;  %s3662_s26 = scalar_lea.hbm %s3710_s10, %s2360_s27  ;;  %s2875_s17 = smov [#allocation5]  }
  0x2d   : > { %2516 = vmatprep.mubr.msk.f32.mxu0 %vm477_vm0, %v3023_v5  ;;  %v3033_v7 = vld [vmem:[%s3014_s30 + $0x88] sm:$0xff]  ;;  %2529 = vmatmul.mubr.msk.f32.vlgmr.msra.gmra.mxu1 %vm477_vm0, %v3020_v4  ;;  %v3066_v13 = vld [vmem:[%s3014_s30 + $0xd8] sm:$0xff]  ;;  %v3075_v16 = vld [vmem:[%s3014_s30 + $0xe0] sm:$0xff]  ;;  %s2812_s21 = sshll.u32 %s2875_s17, 4  ;;  %s2813_s21 = int_to_ptr.vmem [resolvable:$false] %s2812_s21 }
  0x2e   : > { %v446_v9 = vmax.f32 %v3030_v6, %v3033_v7  ;;  %2517 = vmatmul.mubr.msk.f32.vlgmr.msra.gmra.mxu0 %vm477_vm0, %v3033_v7  ;;  %2541 = vmatpush3.msra.mxu1 %v494_v1  ;;  %v3061_v12 = vld [vmem:[%s3014_s30 + $0x108] sm:$0xff]  ;;  %v3069_v14 = vld [vmem:[%s3014_s30 + $0x98] sm:$0xff]  ;;  %v3078_v17 = vld [vmem:[%s3014_s30 + $0xa0] sm:$0xff]  ;;  %p2815_p13 = scmp.lt.s32.totalorder %s2082_s29, %s2813_s21 }
  0x2f   : > { %2531 = vmatprep.mubr.msk.f32.mxu1 %vm477_vm0, %v3048_v10  ;;  %2519 = vmatprep.mubr.msk.f32.mxu0 %vm477_vm0, %v3051_v11  ;;  %v3082_v18 = vld [vmem:[%s3014_s30 + $0xe8] sm:$0xff]  ;;  %v3094_v20 = vld [vmem:[%s3014_s30 + $0xf0] sm:$0xff]  ;;  %v3100_v22 = vld [vmem:[%s3014_s30] sm:$0xff] }
  0x30   : > { %v462_v15 = vmax.f32 %v446_v9, %v3061_v12  ;;  %2592 = vmatprep.subr.mxu1 %v3038_v8  ;;  %v3085_v19 = vld [vmem:[%s3014_s30 + $0xa8] sm:$0xff]  ;;  %2567 = vmatpush3.msra.mxu0 %v882_v2  ;;  %v3097_v21 = vld [vmem:[%s3014_s30 + $0xb0] sm:$0xff]  ;;  %v3110_v24 = vld [vmem:[%s3014_s30 + $0xb8] sm:$0xff]  ;;  %v445_v25 = vmax.f32 %v3100_v22, %v3023_v5 }
  0x31   : > { %2532 = vmatmul.mubr.msk.f32.gmra.mxu1 %vm477_vm0, %v3066_v13  ;;  %v3103_v23 = vld [vmem:[%s3014_s30 + $0x10] sm:$0xff]  ;;  %v3115_v26 = vld [vmem:[%s3014_s30 + $0x100] sm:$0xff]  ;;  %v3120_v28 = vld [vmem:[%s3014_s30 + $0x18] sm:$0xff] }
  0x32   : > { %479 = vst.msk [vmem:[%s3058_s25 + $0x8] sm:$0xff] %vm477_vm0, %v462_v15  ;;  %2520 = vmatmul.mubr.msk.f32.gmra.mxu0 %vm477_vm0, %v3069_v14  ;;  %2534 = vmatprep.mubr.msk.f32.mxu1 %vm477_vm0, %v3075_v16  ;;  %v447_v27 = vmax.f32 %v3103_v23, %v3051_v11  ;;  %v448_v29 = vmax.f32 %v3120_v28, %v3069_v14  ;;  %v3125_v30 = vld [vmem:[%s3014_s30 + $0x110] sm:$0xff]  ;;  %v3128_v31 = vld [vmem:[%s3014_s30 + $0x20] sm:$0xff]  ;;  %v3131_v32 = vld [vmem:[%s3014_s30 + $0x28] sm:$0xff] }
  0x33   : > { %2522 = vmatprep.mubr.msk.f32.mxu0 %vm477_vm0, %v3078_v17  ;;  %v3134_v33 = vld [vmem:[%s3014_s30 + $0xf8] sm:$0xff]  ;;  %v461_v34 = vmax.f32 %v445_v25, %v3115_v26  ;;  %v449_v37 = vmax.f32 %v3128_v31, %v3078_v17  ;;  %v450_v38 = vmax.f32 %v3131_v32, %v3085_v19  ;;  %v3146_v39 = vld [vmem:[%s3014_s30 + $0x30] sm:$0xff]  ;;  %v3157_v42 = vld [vmem:[%s3014_s30 + $0x120] sm:$0xff] }
  0x34   : > { %v463_v35 = vmax.f32 %v447_v27, %v3125_v30  ;;  %v3139_v36 = vld [vmem:[%s3014_s30 + $0x118] sm:$0xff]  ;;  %v3160_v43 = vld [vmem:[%s3014_s30 + $0x128] sm:$0xff]  ;;  %v451_v44 = vmax.f32 %v3146_v39, %v3097_v21  ;;  %v3167_v46 = vld [vmem:[%s3014_s30 + $0x40] sm:$0xff] }
  0x35   : > { %v3149_v40 = vld [vmem:[%s3014_s30 + $0x38] sm:$0xff]  ;;  %2535 = vmatmul.mubr.msk.f32.gmra.mxu1 %vm477_vm0, %v3082_v18  ;;  %v464_v41 = vmax.f32 %v448_v29, %v3139_v36  ;;  %478 = vst.msk [vmem:[%s3058_s25] sm:$0xff] %vm477_vm0, %v461_v34  ;;  %v465_v47 = vmax.f32 %v449_v37, %v3157_v42  ;;  %v466_v48 = vmax.f32 %v450_v38, %v3160_v43  ;;  %v3180_v49 = vld [vmem:[%s3014_s30 + $0x130] sm:$0xff]  ;;  %v3188_v52 = vld [vmem:[%s3014_s30 + $0x48] sm:$0xff] }
  0x36   : > { %2523 = vmatmul.mubr.msk.f32.gmra.mxu0 %vm477_vm0, %v3085_v19  ;;  %v452_v45 = vmax.f32 %v3149_v40, %v3110_v24  ;;  %2537 = vmatprep.mubr.msk.f32.mxu1 %vm477_vm0, %v3094_v20  ;;  %480 = vst.msk [vmem:[%s3058_s25 + $0x10] sm:$0xff] %vm477_vm0, %v463_v35  ;;  %v3183_v50 = vld [vmem:[%s3014_s30 + $0x138] sm:$0xff]  ;;  %v453_v51 = vmax.f32 %v3167_v46, %v3017_v3  ;;  %v3197_v56 = vld [vmem:[%s3014_s30 + $0x140] sm:$0xff]  ;;  %v3200_v57 = vld [vmem:[%s3014_s30 + $0x50] sm:$0xff] }
  0x37   : > { %2525 = vmatprep.mubr.msk.f32.mxu0 %vm477_vm0, %v3097_v21  ;;  %481 = vst.msk [vmem:[%s3058_s25 + $0x18] sm:$0xff] %vm477_vm0, %v464_v41  ;;  %v467_v53 = vmax.f32 %v451_v44, %v3180_v49  ;;  %v454_v55 = vmax.f32 %v3188_v52, %v3020_v4  ;;  %v3203_v58 = vld [vmem:[%s3014_s30 + $0x58] sm:$0xff]  ;;  %482 = vst.msk [vmem:[%s3058_s25 + $0x20] sm:$0xff] %vm477_vm0, %v465_v47  ;;  %v3211_v60 = vld [vmem:[%s3014_s30 + $0x148] sm:$0xff]  ;;  %v455_v61 = vmax.f32 %v3200_v57, %v3048_v10 }
  0x38   : > { %v468_v54 = vmax.f32 %v452_v45, %v3183_v50  ;;  %483 = vst.msk [vmem:[%s3058_s25 + $0x28] sm:$0xff] %vm477_vm0, %v466_v48  ;;  %v469_v59 = vmax.f32 %v453_v51, %v3197_v56  ;;  %v456_v62 = vmax.f32 %v3203_v58, %v3066_v13  ;;  %v3218_v63 = vld [vmem:[%s3014_s30 + $0x60] sm:$0xff]  ;;  %v3221_v0 = vld [vmem:[%s3014_s30 + $0x68] sm:$0xff]  ;;  %v3233_v2 = vld [vmem:[%s3014_s30 + $0x150] sm:$0xff] }
  0x39   : > { %2538 = vmatmul.mubr.msk.f32.gmra.mxu1 %vm477_vm0, %v3134_v33  ;;  %484 = vst.msk [vmem:[%s3058_s25 + $0x30] sm:$0xff] %vm477_vm0, %v467_v53  ;;  %v470_v1 = vmax.f32 %v454_v55, %v3211_v60  ;;  %v3236_v9 = vld [vmem:[%s3014_s30 + $0x158] sm:$0xff]  ;;  %v457_v15 = vmax.f32 %v3218_v63, %v3075_v16  ;;  %v458_v25 = vmax.f32 %v3221_v0, %v3082_v18  ;;  %v3243_v27 = vld [vmem:[%s3014_s30 + $0x70] sm:$0xff]  ;;  %v3254_v35 = vld [vmem:[%s3014_s30 + $0x160] sm:$0xff] }
  0x3a   : > { %2526 = vmatmul.mubr.msk.f32.gmra.mxu0 %vm477_vm0, %v3110_v24  ;;  %485 = vst.msk [vmem:[%s3058_s25 + $0x38] sm:$0xff] %vm477_vm0, %v468_v54  ;;  %2542 = vmatprep.mubr.msk.f32.mxu1 %vm477_vm0, %v3100_v22  ;;  %486 = vst.msk [vmem:[%s3058_s25 + $0x40] sm:$0xff] %vm477_vm0, %v469_v59  ;;  %v471_v29 = vmax.f32 %v455_v61, %v3233_v2  ;;  %v472_v34 = vmax.f32 %v456_v62, %v3236_v9  ;;  %v3257_v37 = vld [vmem:[%s3014_s30 + $0x168] sm:$0xff]  ;;  %v412_v41 = vld [vmem:[%s3014_s30 + $0x78] sm:$0xff] }
  0x3b   : > { %2568 = vmatprep.mubr.msk.f32.mxu0 %vm477_vm0, %v3115_v26  ;;  %v459_v38 = vmax.f32 %v3243_v27, %v3094_v20  ;;  %487 = vst.msk [vmem:[%s3058_s25 + $0x48] sm:$0xff] %vm477_vm0, %v470_v1  ;;  %v473_v44 = vmax.f32 %v457_v15, %v3254_v35  ;;  %v474_v45 = vmax.f32 %v458_v25, %v3257_v37  ;;  %v3268_v48 = vld [vmem:[%s3014_s30 + $0x170] sm:$0xff]  ;;  %v3276_v53 = vld [vmem:[%s3014_s30 + $0x178] sm:$0xff] }
  0x3c   : > { %v460_v47 = vmax.f32 %v412_v41, %v3134_v33  ;;  %488 = vst.msk [vmem:[%s3058_s25 + $0x50] sm:$0xff] %vm477_vm0, %v471_v29  ;;  %489 = vst.msk [vmem:[%s3058_s25 + $0x58] sm:$0xff] %vm477_vm0, %v472_v34 }
  0x3d   : > { %v475_v51 = vmax.f32 %v459_v38, %v3268_v48  ;;  %2543 = vmatmul.mubr.msk.f32.vlgmr.msra.gmra.mxu1 %vm477_vm0, %v3030_v6  ;;  %490 = vst.msk [vmem:[%s3058_s25 + $0x60] sm:$0xff] %vm477_vm0, %v473_v44  ;;  %491 = vst.msk [vmem:[%s3058_s25 + $0x68] sm:$0xff] %vm477_vm0, %v474_v45 }
  0x3e   : > { %2569 = vmatmul.mubr.msk.f32.vlgmr.msra.gmra.mxu0 %vm477_vm0, %v3061_v12  ;;  %v476_v54 = vmax.f32 %v460_v47, %v3276_v53  ;;  %2593 = vmatpush3.msra.mxu1 %v3038_v8 }
  0x3f   : > { %2545 = vmatprep.mubr.msk.f32.mxu1 %vm477_vm0, %v3103_v23  ;;  %492 = vst.msk [vmem:[%s3058_s25 + $0x70] sm:$0xff] %vm477_vm0, %v475_v51  ;;  %2571 = vmatprep.mubr.msk.f32.mxu0 %vm477_vm0, %v3125_v30 }
  0x40   : > { %493 = vst.msk [vmem:[%s3058_s25 + $0x78] sm:$0xff] %vm477_vm0, %v476_v54  ;;  %s2037_s25 = smul.f32 0.0013020834, %s2030_s18 }
  0x41   : > { %2546 = vmatmul.mubr.msk.f32.gmra.mxu1 %vm477_vm0, %v3120_v28 }
  0x42   : > { %2572 = vmatmul.mubr.msk.f32.gmra.mxu0 %vm477_vm0, %v3139_v36  ;;  %2548 = vmatprep.mubr.msk.f32.mxu1 %vm477_vm0, %v3128_v31 }
  0x43   : > { %2574 = vmatprep.mubr.msk.f32.mxu0 %vm477_vm0, %v3157_v42 }
  0x45   : > { %2549 = vmatmul.mubr.msk.f32.gmra.mxu1 %vm477_vm0, %v3131_v32 }
  0x46   : > { %2575 = vmatmul.mubr.msk.f32.gmra.mxu0 %vm477_vm0, %v3160_v43  ;;  %2551 = vmatprep.mubr.msk.f32.mxu1 %vm477_vm0, %v3146_v39 }
  0x47   : > { %2577 = vmatprep.mubr.msk.f32.mxu0 %vm477_vm0, %v3180_v49 }
  0x49   : > { %2552 = vmatmul.mubr.msk.f32.gmra.mxu1 %vm477_vm0, %v3149_v40 }
  0x4a   : > { %2578 = vmatmul.mubr.msk.f32.gmra.mxu0 %vm477_vm0, %v3183_v50  ;;  %2554 = vmatprep.mubr.msk.f32.mxu1 %vm477_vm0, %v3167_v46 }
  0x4b   : > { %2580 = vmatprep.mubr.msk.f32.mxu0 %vm477_vm0, %v3197_v56 }
  0x4d   : > { %2555 = vmatmul.mubr.msk.f32.gmra.mxu1 %vm477_vm0, %v3188_v52 }
  0x4e   : > { %2581 = vmatmul.mubr.msk.f32.gmra.mxu0 %vm477_vm0, %v3211_v60  ;;  %2557 = vmatprep.mubr.msk.f32.mxu1 %vm477_vm0, %v3200_v57 }
  0x4f   : > { %2583 = vmatprep.mubr.msk.f32.mxu0 %vm477_vm0, %v3233_v2 }
  0x51   : > { %2558 = vmatmul.mubr.msk.f32.gmra.mxu1 %vm477_vm0, %v3203_v58 }
  0x52   : > { %2584 = vmatmul.mubr.msk.f32.gmra.mxu0 %vm477_vm0, %v3236_v9  ;;  %2560 = vmatprep.mubr.msk.f32.mxu1 %vm477_vm0, %v3218_v63 }
  0x53   : > { %2586 = vmatprep.mubr.msk.f32.mxu0 %vm477_vm0, %v3254_v35 }
  0x55   : > { %2561 = vmatmul.mubr.msk.f32.gmra.mxu1 %vm477_vm0, %v3221_v0 }
  0x56   : > { %2587 = vmatmul.mubr.msk.f32.gmra.mxu0 %vm477_vm0, %v3257_v37  ;;  %2563 = vmatprep.mubr.msk.f32.mxu1 %vm477_vm0, %v3243_v27 }
  0x57   : > { %2589 = vmatprep.mubr.msk.f32.mxu0 %vm477_vm0, %v3268_v48 }
  0x59   : > { %2564 = vmatmul.mubr.msk.f32.gmra.mxu1 %vm477_vm0, %v412_v41 }
  0x5a   : > { %2590 = vmatmul.mubr.msk.f32.gmra.mxu0 %vm477_vm0, %v3276_v53  ;;  %2594 = vmatprep.mubr.msk.f32.mxu1 %vm477_vm0, %v3100_v22 }
  0x5d   : > { %2595 = vmatmul.mubr.msk.f32.vlgmr.msra.gmra.mxu1 %vm477_vm0, %v3030_v6 }
  0x5e   : > { %2597 = vmatprep.mubr.msk.f32.mxu1 %vm477_vm0, %v3103_v23 }
  0x61   : > { %2598 = vmatmul.mubr.msk.f32.gmra.mxu1 %vm477_vm0, %v3120_v28 }
  0x62   : > { %2600 = vmatprep.mubr.msk.f32.mxu1 %vm477_vm0, %v3128_v31 }
  0x65   : > { %2601 = vmatmul.mubr.msk.f32.gmra.mxu1 %vm477_vm0, %v3131_v32 }
  0x66   : > { %2603 = vmatprep.mubr.msk.f32.mxu1 %vm477_vm0, %v3146_v39 }
  0x69   : > { %2604 = vmatmul.mubr.msk.f32.gmra.mxu1 %vm477_vm0, %v3149_v40 }
  0x6a   : > { %2606 = vmatprep.mubr.msk.f32.mxu1 %vm477_vm0, %v3167_v46 }
  0x6d   : > { %2607 = vmatmul.mubr.msk.f32.gmra.mxu1 %vm477_vm0, %v3188_v52 }
  0x6e   : > { %2609 = vmatprep.mubr.msk.f32.mxu1 %vm477_vm0, %v3200_v57 }
  0x71   : > { %2610 = vmatmul.mubr.msk.f32.gmra.mxu1 %vm477_vm0, %v3203_v58 }
  0x72   : > { %2612 = vmatprep.mubr.msk.f32.mxu1 %vm477_vm0, %v3218_v63 }
  0x75   : > { %2613 = vmatmul.mubr.msk.f32.gmra.mxu1 %vm477_vm0, %v3221_v0 }
  0x76   : > { %2615 = vmatprep.mubr.msk.f32.mxu1 %vm477_vm0, %v3243_v27 }
  0x79   : > { %2616 = vmatmul.mubr.msk.f32.gmra.mxu1 %vm477_vm0, %v412_v41 }
  0x7a   : > { %2618 = vmatprep.mubr.msk.f32.mxu1 %vm477_vm0, %v3023_v5  ;;  %v1469_v5 = vld [vmem:[%s3703_s3] sm:$0xff] }
  0x7b   : > { %2666 = vmatprep.subr.mxu0 %v1469_v5 }
  0x7c   : > { %2667 = vmatpush3.msra.mxu0 %v1469_v5 }
  0x7d   : > { %2619 = vmatmul.mubr.msk.f32.gmra.mxu1 %vm477_vm0, %v3033_v7 }
  0x7e   : > { %2621 = vmatprep.mubr.msk.f32.mxu1 %vm477_vm0, %v3051_v11 }
  0x81   : > { %2622 = vmatmul.mubr.msk.f32.gmra.mxu1 %vm477_vm0, %v3069_v14 }
  0x82   : > { %2624 = vmatprep.mubr.msk.f32.mxu1 %vm477_vm0, %v3078_v17 }
  0x85   : > { %2625 = vmatmul.mubr.msk.f32.gmra.mxu1 %vm477_vm0, %v3085_v19 }
  0x86   : > { %2627 = vmatprep.mubr.msk.f32.mxu1 %vm477_vm0, %v3097_v21 }
  0x89   : > { %2628 = vmatmul.mubr.msk.f32.gmra.mxu1 %vm477_vm0, %v3110_v24 }
  0x8a   : > { %2630 = vmatprep.mubr.msk.f32.mxu1 %vm477_vm0, %v3017_v3 }
  0x8d   : > { %2631 = vmatmul.mubr.msk.f32.gmra.mxu1 %vm477_vm0, %v3020_v4 }
  0x8e   : > { %2633 = vmatprep.mubr.msk.f32.mxu1 %vm477_vm0, %v3048_v10 }
  0x91   : > { %2634 = vmatmul.mubr.msk.f32.gmra.mxu1 %vm477_vm0, %v3066_v13 }
  0x92   : > { %2636 = vmatprep.mubr.msk.f32.mxu1 %vm477_vm0, %v3075_v16 }
  0x95   : > { %2637 = vmatmul.mubr.msk.f32.gmra.mxu1 %vm477_vm0, %v3082_v18 }
  0x96   : > { %2639 = vmatprep.mubr.msk.f32.mxu1 %vm477_vm0, %v3094_v20 }
  0x99   : > { %2640 = vmatmul.mubr.msk.f32.gmra.mxu1 %vm477_vm0, %v3134_v33 }
  0x9a   : > { %2642 = vmatprep.mubr.msk.f32.mxu1 %vm477_vm0, %v3115_v26 }
  0x9d   : > { %2643 = vmatmul.mubr.msk.f32.gmra.mxu1 %vm477_vm0, %v3061_v12 }
  0x9e   : > { %2645 = vmatprep.mubr.msk.f32.mxu1 %vm477_vm0, %v3125_v30 }
  0xa1   : > { %2646 = vmatmul.mubr.msk.f32.gmra.mxu1 %vm477_vm0, %v3139_v36 }
  0xa2   : > { %2648 = vmatprep.mubr.msk.f32.mxu1 %vm477_vm0, %v3157_v42 }
  0xa5   : > { %2649 = vmatmul.mubr.msk.f32.gmra.mxu1 %vm477_vm0, %v3160_v43 }
  0xa6   : > { %2651 = vmatprep.mubr.msk.f32.mxu1 %vm477_vm0, %v3180_v49 }
  0xa9   : > { %2652 = vmatmul.mubr.msk.f32.gmra.mxu1 %vm477_vm0, %v3183_v50 }
  0xaa   : > { %2654 = vmatprep.mubr.msk.f32.mxu1 %vm477_vm0, %v3197_v56 }
  0xad   : > { %2655 = vmatmul.mubr.msk.f32.gmra.mxu1 %vm477_vm0, %v3211_v60 }
  0xae   : > { %2657 = vmatprep.mubr.msk.f32.mxu1 %vm477_vm0, %v3233_v2 }
  0xb1   : > { %2658 = vmatmul.mubr.msk.f32.gmra.mxu1 %vm477_vm0, %v3236_v9 }
  0xb2   : > { %2660 = vmatprep.mubr.msk.f32.mxu1 %vm477_vm0, %v3254_v35 }
  0xb5   : > { %2661 = vmatmul.mubr.msk.f32.gmra.mxu1 %vm477_vm0, %v3257_v37 }
  0xb6   : > { %2663 = vmatprep.mubr.msk.f32.mxu1 %vm477_vm0, %v3268_v48 }
  0xb9   : > { %2664 = vmatmul.mubr.msk.f32.gmra.mxu1 %vm477_vm0, %v3276_v53 }
  0xed   : > { %v2530_v3 = vpop.f32.mrf.mxu1 }
  0xee   : > { %v2518_v4 = vpop.f32.mrf.mxu0 }
  0xef   : > { %v650_v6 = vpop.f32.mrf.mxu1 }
  0xf0   : > { %v610_v7 = vpop.f32.mrf.mxu0 }
  0xf1   : > { %v3445_v8 = vpop.f32.mrf.mxu1 }
  0xf2   : > { %v2521_v10 = vpop.f32.mrf.mxu0 }
  0xf3   : > { %v3447_v11 = vpop.f32.mrf.mxu1 }
  0xf4   : > { %v620_v12 = vpop.f32.mrf.mxu0 }
  0xf5   : > { %v3449_v13 = vpop.f32.mrf.mxu1 }
  0xf6   : > { %v2524_v14 = vpop.f32.mrf.mxu0 }
  0xf7   : > { %v3451_v16 = vpop.f32.mrf.mxu1 }
  0xf8   : > { %v630_v17 = vpop.f32.mrf.mxu0 }
  0xf9   : > { %v3453_v18 = vpop.f32.mrf.mxu1 }
  0xfa   : > { %v2527_v19 = vpop.f32.mrf.mxu0 }
  0xfb   : > { %v3455_v20 = vpop.f32.mrf.mxu1 }
  0xfc   : > { %v640_v21 = vpop.f32.mrf.mxu0 }
  0xfd   : > { %v2544_v22 = vpop.f32.mrf.mxu1 }
  0xfe   : > { %v2570_v23 = vpop.f32.mrf.mxu0  ;;  %v809_v24 = vadd.f32 %v2544_v22, %v2518_v4 }
  0xff   : > { %v803_v26 = vpop.f32.mrf.mxu1 }
 0x100   : > { %v997_v28 = vpop.f32.mrf.mxu0  ;;  %v804_v30 = vadd.f32 %v803_v26, %v610_v7  ;;  %v1077_v31 = vadd.f32 %v2570_v23, %v809_v24 }
 0x101   : > { %v2547_v32 = vpop.f32.mrf.mxu1 }
 0x102   : > { %v2573_v33 = vpop.f32.mrf.mxu0  ;;  %1093 = vst.msk [vmem:[%s3462_s11 + $0x8] sm:$0xff] %vm477_vm0, %v1077_v31  ;;  %v819_v36 = vadd.f32 %v2547_v32, %v2521_v10  ;;  %v1076_v39 = vadd.f32 %v997_v28, %v804_v30 }
 0x103   : > { %v813_v40 = vpop.f32.mrf.mxu1 }
 0x104   : > { %v1007_v42 = vpop.f32.mrf.mxu0  ;;  %1092 = vst.msk [vmem:[%s3462_s11] sm:$0xff] %vm477_vm0, %v1076_v39  ;;  %v814_v43 = vadd.f32 %v813_v40, %v620_v12  ;;  %v1079_v46 = vadd.f32 %v2573_v33, %v819_v36 }
 0x105   : > { %v2550_v49 = vpop.f32.mrf.mxu1 }
 0x106   : > { %v2576_v50 = vpop.f32.mrf.mxu0  ;;  %1095 = vst.msk [vmem:[%s3462_s11 + $0x18] sm:$0xff] %vm477_vm0, %v1079_v46  ;;  %v829_v52 = vadd.f32 %v2550_v49, %v2524_v14  ;;  %v1078_v55 = vadd.f32 %v1007_v42, %v814_v43 }
 0x107   : > { %v823_v56 = vpop.f32.mrf.mxu1 }
 0x108   : > { %v1017_v57 = vpop.f32.mrf.mxu0  ;;  %1094 = vst.msk [vmem:[%s3462_s11 + $0x10] sm:$0xff] %vm477_vm0, %v1078_v55  ;;  %v824_v58 = vadd.f32 %v823_v56, %v630_v17  ;;  %v1081_v59 = vadd.f32 %v2576_v50, %v829_v52 }
 0x109   : > { %v2553_v60 = vpop.f32.mrf.mxu1 }
 0x10a   : > { %v2579_v61 = vpop.f32.mrf.mxu0  ;;  %1097 = vst.msk [vmem:[%s3462_s11 + $0x28] sm:$0xff] %vm477_vm0, %v1081_v59  ;;  %v839_v62 = vadd.f32 %v2553_v60, %v2527_v19  ;;  %v1080_v63 = vadd.f32 %v1017_v57, %v824_v58 }
 0x10b   : > { %v833_v0 = vpop.f32.mrf.mxu1 }
 0x10c   : > { %v1027_v1 = vpop.f32.mrf.mxu0  ;;  %1096 = vst.msk [vmem:[%s3462_s11 + $0x20] sm:$0xff] %vm477_vm0, %v1080_v63  ;;  %v834_v2 = vadd.f32 %v833_v0, %v640_v21  ;;  %v1083_v9 = vadd.f32 %v2579_v61, %v839_v62 }
 0x10d   : > { %v2556_v15 = vpop.f32.mrf.mxu1 }
 0x10e   : > { %v2582_v25 = vpop.f32.mrf.mxu0  ;;  %1099 = vst.msk [vmem:[%s3462_s11 + $0x38] sm:$0xff] %vm477_vm0, %v1083_v9  ;;  %v849_v27 = vadd.f32 %v2556_v15, %v2530_v3  ;;  %v1082_v29 = vadd.f32 %v1027_v1, %v834_v2 }
 0x10f   : > { %v843_v34 = vpop.f32.mrf.mxu1 }
 0x110   : > { %v1037_v35 = vpop.f32.mrf.mxu0  ;;  %1098 = vst.msk [vmem:[%s3462_s11 + $0x30] sm:$0xff] %vm477_vm0, %v1082_v29  ;;  %v844_v37 = vadd.f32 %v843_v34, %v650_v6  ;;  %v1085_v38 = vadd.f32 %v2582_v25, %v849_v27 }
 0x111   : > { %v2559_v41 = vpop.f32.mrf.mxu1 }
 0x112   : > { %v2585_v44 = vpop.f32.mrf.mxu0  ;;  %1101 = vst.msk [vmem:[%s3462_s11 + $0x48] sm:$0xff] %vm477_vm0, %v1085_v38  ;;  %v859_v45 = vadd.f32 %v2559_v41, %v3445_v8  ;;  %v1084_v47 = vadd.f32 %v1037_v35, %v844_v37 }
 0x113   : > { %v853_v48 = vpop.f32.mrf.mxu1 }
 0x114   : > { %v1047_v51 = vpop.f32.mrf.mxu0  ;;  %1100 = vst.msk [vmem:[%s3462_s11 + $0x40] sm:$0xff] %vm477_vm0, %v1084_v47  ;;  %v854_v53 = vadd.f32 %v853_v48, %v3447_v11  ;;  %v1087_v54 = vadd.f32 %v2585_v44, %v859_v45 }
 0x115   : > { %v2562_v5 = vpop.f32.mrf.mxu1 }
 0x116   : > { %v2588_v3 = vpop.f32.mrf.mxu0  ;;  %1103 = vst.msk [vmem:[%s3462_s11 + $0x58] sm:$0xff] %vm477_vm0, %v1087_v54  ;;  %v869_v4 = vadd.f32 %v2562_v5, %v3449_v13  ;;  %v1086_v6 = vadd.f32 %v1047_v51, %v854_v53 }
 0x117   : > { %v863_v7 = vpop.f32.mrf.mxu1 }
 0x118   : > { %v1057_v10 = vpop.f32.mrf.mxu0  ;;  %1102 = vst.msk [vmem:[%s3462_s11 + $0x50] sm:$0xff] %vm477_vm0, %v1086_v6  ;;  %v864_v8 = vadd.f32 %v863_v7, %v3451_v16  ;;  %v1089_v12 = vadd.f32 %v2588_v3, %v869_v4  ;;  %v3501_v16 = vld [vmem:[%s3702_s2] ss:$0 sm:$0xff] }
 0x119   : > { %v2565_v14 = vpop.f32.mrf.mxu1 }
 0x11a   : > { %v2591_v11 = vpop.f32.mrf.mxu0  ;;  %1105 = vst.msk [vmem:[%s3462_s11 + $0x68] sm:$0xff] %vm477_vm0, %v1089_v12  ;;  %v879_v17 = vadd.f32 %v2565_v14, %v3453_v18  ;;  %v1088_v19 = vadd.f32 %v1057_v10, %v864_v8 }
 0x11b   : > { %v873_v21 = vpop.f32.mrf.mxu1 }
 0x11c   : > { %v1067_v22 = vpop.f32.mrf.mxu0  ;;  %1104 = vst.msk [vmem:[%s3462_s11 + $0x60] sm:$0xff] %vm477_vm0, %v1088_v19  ;;  %v874_v13 = vadd.f32 %v873_v21, %v3455_v20  ;;  %v1091_v23 = vadd.f32 %v2591_v11, %v879_v17 }
 0x11d   : > { %v2596_v24 = vpop.f32.mrf.mxu1 }
 0x11e   : > { %1107 = vst.msk [vmem:[%s3462_s11 + $0x78] sm:$0xff] %vm477_vm0, %v1091_v23  ;;  %v1090_v26 = vadd.f32 %v1067_v22, %v874_v13  ;;  %v1188_v28 = vadd.f32 %v2596_v24, %v3501_v16 }
 0x11f   : > { %v1182_v18 = vpop.f32.mrf.mxu1 }
 0x120   : > { %1106 = vst.msk [vmem:[%s3462_s11 + $0x70] sm:$0xff] %vm477_vm0, %v1090_v26  ;;  %v1183_v30 = vadd.f32 %v3501_v16, %v1182_v18  ;;  %v1422_v20 = vmax.f32 %v1188_v28, 0.0 }
 0x121   : > { %v2599_v31 = vpop.f32.mrf.mxu1 }
 0x122   : > { %v1421_v32 = vmax.f32 %v1183_v30, 0.0  ;;  %v1198_v33 = vadd.f32 %v2599_v31, %v3501_v16 }
 0x123   : > { %v1192_v36 = vpop.f32.mrf.mxu1 }
 0x124   : > { %v1193_v39 = vadd.f32 %v3501_v16, %v1192_v36  ;;  %2668 = vmatprep.mubr.msk.f32.mxu0 %vm477_vm0, %v1421_v32  ;;  %v1424_v43 = vmax.f32 %v1198_v33, 0.0 }
 0x125   : > { %v2602_v40 = vpop.f32.mrf.mxu1  ;;  %2669 = vmatmul.mubr.msk.f32.vlgmr.msra.gmra.mxu0 %vm477_vm0, %v1422_v20 }
 0x126   : > { %v1423_v42 = vmax.f32 %v1193_v39, 0.0  ;;  %v1208_v46 = vadd.f32 %v2602_v40, %v3501_v16 }
 0x127   : > { %v1202_v49 = vpop.f32.mrf.mxu1 }
 0x128   : > { %v1203_v50 = vadd.f32 %v3501_v16, %v1202_v49  ;;  %2671 = vmatprep.mubr.msk.f32.mxu0 %vm477_vm0, %v1423_v42  ;;  %v1426_v56 = vmax.f32 %v1208_v46, 0.0 }
 0x129   : > { %v2605_v52 = vpop.f32.mrf.mxu1  ;;  %2672 = vmatmul.mubr.msk.f32.gmra.mxu0 %vm477_vm0, %v1424_v43 }
 0x12a   : > { %v1425_v55 = vmax.f32 %v1203_v50, 0.0  ;;  %v1218_v57 = vadd.f32 %v2605_v52, %v3501_v16 }
 0x12b   : > { %v1212_v58 = vpop.f32.mrf.mxu1 }
 0x12c   : > { %v1213_v59 = vadd.f32 %v3501_v16, %v1212_v58  ;;  %2674 = vmatprep.mubr.msk.f32.mxu0 %vm477_vm0, %v1425_v55  ;;  %v1428_v62 = vmax.f32 %v1218_v57, 0.0 }
 0x12d   : > { %v2608_v60 = vpop.f32.mrf.mxu1  ;;  %2675 = vmatmul.mubr.msk.f32.gmra.mxu0 %vm477_vm0, %v1426_v56 }
 0x12e   : > { %v1427_v61 = vmax.f32 %v1213_v59, 0.0  ;;  %v1228_v63 = vadd.f32 %v2608_v60, %v3501_v16 }
 0x12f   : > { %v1222_v0 = vpop.f32.mrf.mxu1 }
 0x130   : > { %v1223_v1 = vadd.f32 %v3501_v16, %v1222_v0  ;;  %2677 = vmatprep.mubr.msk.f32.mxu0 %vm477_vm0, %v1427_v61  ;;  %v1430_v15 = vmax.f32 %v1228_v63, 0.0 }
 0x131   : > { %v2611_v2 = vpop.f32.mrf.mxu1  ;;  %2678 = vmatmul.mubr.msk.f32.gmra.mxu0 %vm477_vm0, %v1428_v62 }
 0x132   : > { %v1429_v9 = vmax.f32 %v1223_v1, 0.0  ;;  %v1238_v25 = vadd.f32 %v2611_v2, %v3501_v16 }
 0x133   : > { %v1232_v27 = vpop.f32.mrf.mxu1 }
 0x134   : > { %v1233_v29 = vadd.f32 %v3501_v16, %v1232_v27  ;;  %2680 = vmatprep.mubr.msk.f32.mxu0 %vm477_vm0, %v1429_v9  ;;  %v1432_v37 = vmax.f32 %v1238_v25, 0.0 }
 0x135   : > { %v2614_v34 = vpop.f32.mrf.mxu1  ;;  %2681 = vmatmul.mubr.msk.f32.gmra.mxu0 %vm477_vm0, %v1430_v15 }
 0x136   : > { %v1431_v35 = vmax.f32 %v1233_v29, 0.0  ;;  %v1248_v38 = vadd.f32 %v2614_v34, %v3501_v16 }
 0x137   : > { %v1242_v41 = vpop.f32.mrf.mxu1 }
 0x138   : > { %v1243_v44 = vadd.f32 %v3501_v16, %v1242_v41  ;;  %2683 = vmatprep.mubr.msk.f32.mxu0 %vm477_vm0, %v1431_v35  ;;  %v1434_v48 = vmax.f32 %v1248_v38, 0.0 }
 0x139   : > { %v2617_v45 = vpop.f32.mrf.mxu1  ;;  %2684 = vmatmul.mubr.msk.f32.gmra.mxu0 %vm477_vm0, %v1432_v37 }
 0x13a   : > { %v1433_v47 = vmax.f32 %v1243_v44, 0.0  ;;  %v1258_v51 = vadd.f32 %v2617_v45, %v3501_v16 }
 0x13b   : > { %v1252_v53 = vpop.f32.mrf.mxu1 }
 0x13c   : > { %v1253_v54 = vadd.f32 %v3501_v16, %v1252_v53  ;;  %2686 = vmatprep.mubr.msk.f32.mxu0 %vm477_vm0, %v1433_v47  ;;  %v1436_v4 = vmax.f32 %v1258_v51, 0.0 }
 0x13d   : > { %v2620_v5 = vpop.f32.mrf.mxu1  ;;  %2687 = vmatmul.mubr.msk.f32.gmra.mxu0 %vm477_vm0, %v1434_v48 }
 0x13e   : > { %v1435_v3 = vmax.f32 %v1253_v54, 0.0  ;;  %v1268_v6 = vadd.f32 %v2620_v5, %v3501_v16 }
 0x13f   : > { %v1262_v7 = vpop.f32.mrf.mxu1 }
 0x140   : > { %v1263_v10 = vadd.f32 %v3501_v16, %v1262_v7  ;;  %2689 = vmatprep.mubr.msk.f32.mxu0 %vm477_vm0, %v1435_v3  ;;  %v1438_v14 = vmax.f32 %v1268_v6, 0.0 }
 0x141   : > { %v2623_v8 = vpop.f32.mrf.mxu1  ;;  %2690 = vmatmul.mubr.msk.f32.gmra.mxu0 %vm477_vm0, %v1436_v4 }
 0x142   : > { %v1437_v12 = vmax.f32 %v1263_v10, 0.0  ;;  %v1278_v11 = vadd.f32 %v2623_v8, %v3501_v16 }
 0x143   : > { %v1272_v17 = vpop.f32.mrf.mxu1 }
 0x144   : > { %v1273_v19 = vadd.f32 %v3501_v16, %v1272_v17  ;;  %2692 = vmatprep.mubr.msk.f32.mxu0 %vm477_vm0, %v1437_v12  ;;  %v1440_v13 = vmax.f32 %v1278_v11, 0.0 }
 0x145   : > { %v2626_v21 = vpop.f32.mrf.mxu1  ;;  %2693 = vmatmul.mubr.msk.f32.gmra.mxu0 %vm477_vm0, %v1438_v14 }
 0x146   : > { %v1439_v22 = vmax.f32 %v1273_v19, 0.0  ;;  %v1288_v23 = vadd.f32 %v2626_v21, %v3501_v16 }
 0x147   : > { %v1282_v24 = vpop.f32.mrf.mxu1 }
 0x148   : > { %v1283_v26 = vadd.f32 %v3501_v16, %v1282_v24  ;;  %2695 = vmatprep.mubr.msk.f32.mxu0 %vm477_vm0, %v1439_v22  ;;  %v1442_v30 = vmax.f32 %v1288_v23, 0.0 }
 0x149   : > { %v2629_v28 = vpop.f32.mrf.mxu1  ;;  %2696 = vmatmul.mubr.msk.f32.gmra.mxu0 %vm477_vm0, %v1440_v13 }
 0x14a   : > { %v1441_v18 = vmax.f32 %v1283_v26, 0.0  ;;  %v1298_v31 = vadd.f32 %v2629_v28, %v3501_v16 }
 0x14b   : > { %v1292_v32 = vpop.f32.mrf.mxu1 }
 0x14c   : > { %v1293_v20 = vadd.f32 %v3501_v16, %v1292_v32  ;;  %2698 = vmatprep.mubr.msk.f32.mxu0 %vm477_vm0, %v1441_v18  ;;  %v1444_v39 = vmax.f32 %v1298_v31, 0.0 }
 0x14d   : > { %v2632_v33 = vpop.f32.mrf.mxu1  ;;  %2699 = vmatmul.mubr.msk.f32.gmra.mxu0 %vm477_vm0, %v1442_v30 }
 0x14e   : > { %v1443_v36 = vmax.f32 %v1293_v20, 0.0  ;;  %v1308_v40 = vadd.f32 %v2632_v33, %v3501_v16 }
 0x14f   : > { %v1302_v42 = vpop.f32.mrf.mxu1 }
 0x150   : > { %v1303_v43 = vadd.f32 %v3501_v16, %v1302_v42  ;;  %2701 = vmatprep.mubr.msk.f32.mxu0 %vm477_vm0, %v1443_v36  ;;  %v1446_v50 = vmax.f32 %v1308_v40, 0.0 }
 0x151   : > { %v2635_v46 = vpop.f32.mrf.mxu1  ;;  %2702 = vmatmul.mubr.msk.f32.gmra.mxu0 %vm477_vm0, %v1444_v39 }
 0x152   : > { %v1445_v49 = vmax.f32 %v1303_v43, 0.0  ;;  %v1318_v52 = vadd.f32 %v2635_v46, %v3501_v16 }
 0x153   : > { %v1312_v55 = vpop.f32.mrf.mxu1 }
 0x154   : > { %v1313_v56 = vadd.f32 %v3501_v16, %v1312_v55  ;;  %2704 = vmatprep.mubr.msk.f32.mxu0 %vm477_vm0, %v1445_v49  ;;  %v1448_v59 = vmax.f32 %v1318_v52, 0.0 }
 0x155   : > { %v2638_v57 = vpop.f32.mrf.mxu1  ;;  %2705 = vmatmul.mubr.msk.f32.gmra.mxu0 %vm477_vm0, %v1446_v50 }
 0x156   : > { %v1447_v58 = vmax.f32 %v1313_v56, 0.0  ;;  %v1328_v60 = vadd.f32 %v2638_v57, %v3501_v16 }
 0x157   : > { %v1322_v61 = vpop.f32.mrf.mxu1 }
 0x158   : > { %v1323_v62 = vadd.f32 %v3501_v16, %v1322_v61  ;;  %2707 = vmatprep.mubr.msk.f32.mxu0 %vm477_vm0, %v1447_v58  ;;  %v1450_v1 = vmax.f32 %v1328_v60, 0.0 }
 0x159   : > { %v2641_v63 = vpop.f32.mrf.mxu1  ;;  %2708 = vmatmul.mubr.msk.f32.gmra.mxu0 %vm477_vm0, %v1448_v59 }
 0x15a   : > { %v1449_v0 = vmax.f32 %v1323_v62, 0.0  ;;  %v1338_v2 = vadd.f32 %v2641_v63, %v3501_v16 }
 0x15b   : > { %v1332_v9 = vpop.f32.mrf.mxu1 }
 0x15c   : > { %v1333_v15 = vadd.f32 %v3501_v16, %v1332_v9  ;;  %2710 = vmatprep.mubr.msk.f32.mxu0 %vm477_vm0, %v1449_v0  ;;  %v1452_v29 = vmax.f32 %v1338_v2, 0.0 }
 0x15d   : > { %v2644_v25 = vpop.f32.mrf.mxu1  ;;  %2711 = vmatmul.mubr.msk.f32.gmra.mxu0 %vm477_vm0, %v1450_v1 }
 0x15e   : > { %v1451_v27 = vmax.f32 %v1333_v15, 0.0  ;;  %v1348_v34 = vadd.f32 %v2644_v25, %v3501_v16 }
 0x15f   : > { %v1342_v35 = vpop.f32.mrf.mxu1 }
 0x160   : > { %v1343_v37 = vadd.f32 %v3501_v16, %v1342_v35  ;;  %2713 = vmatprep.mubr.msk.f32.mxu0 %vm477_vm0, %v1451_v27  ;;  %v1454_v44 = vmax.f32 %v1348_v34, 0.0 }
 0x161   : > { %v2647_v38 = vpop.f32.mrf.mxu1  ;;  %2714 = vmatmul.mubr.msk.f32.gmra.mxu0 %vm477_vm0, %v1452_v29 }
 0x162   : > { %v1453_v41 = vmax.f32 %v1343_v37, 0.0  ;;  %v1358_v45 = vadd.f32 %v2647_v38, %v3501_v16 }
 0x163   : > { %v1352_v47 = vpop.f32.mrf.mxu1 }
 0x164   : > { %v1353_v48 = vadd.f32 %v3501_v16, %v1352_v47  ;;  %2716 = vmatprep.mubr.msk.f32.mxu0 %vm477_vm0, %v1453_v41  ;;  %v1456_v54 = vmax.f32 %v1358_v45, 0.0 }
 0x165   : > { %v2650_v51 = vpop.f32.mrf.mxu1  ;;  %2717 = vmatmul.mubr.msk.f32.gmra.mxu0 %vm477_vm0, %v1454_v44 }
 0x166   : > { %v1455_v53 = vmax.f32 %v1353_v48, 0.0  ;;  %v1368_v5 = vadd.f32 %v2650_v51, %v3501_v16 }
 0x167   : > { %v1362_v3 = vpop.f32.mrf.mxu1 }
 0x168   : > { %v1363_v4 = vadd.f32 %v3501_v16, %v1362_v3  ;;  %2719 = vmatprep.mubr.msk.f32.mxu0 %vm477_vm0, %v1455_v53  ;;  %v1458_v10 = vmax.f32 %v1368_v5, 0.0 }
 0x169   : > { %v2653_v6 = vpop.f32.mrf.mxu1  ;;  %2720 = vmatmul.mubr.msk.f32.gmra.mxu0 %vm477_vm0, %v1456_v54 }
 0x16a   : > { %v1457_v7 = vmax.f32 %v1363_v4, 0.0  ;;  %v1378_v8 = vadd.f32 %v2653_v6, %v3501_v16 }
 0x16b   : > { %v1372_v12 = vpop.f32.mrf.mxu1 }
 0x16c   : > { %v1373_v14 = vadd.f32 %v3501_v16, %v1372_v12  ;;  %2722 = vmatprep.mubr.msk.f32.mxu0 %vm477_vm0, %v1457_v7  ;;  %v1460_v19 = vmax.f32 %v1378_v8, 0.0 }
 0x16d   : > { %v2656_v11 = vpop.f32.mrf.mxu1  ;;  %2723 = vmatmul.mubr.msk.f32.gmra.mxu0 %vm477_vm0, %v1458_v10 }
 0x16e   : > { %v1459_v17 = vmax.f32 %v1373_v14, 0.0  ;;  %v1388_v21 = vadd.f32 %v2656_v11, %v3501_v16 }
 0x16f   : > { %v1382_v22 = vpop.f32.mrf.mxu1 }
 0x170   : > { %v1383_v13 = vadd.f32 %v3501_v16, %v1382_v22  ;;  %2725 = vmatprep.mubr.msk.f32.mxu0 %vm477_vm0, %v1459_v17  ;;  %v1462_v26 = vmax.f32 %v1388_v21, 0.0 }
 0x171   : > { %v2659_v23 = vpop.f32.mrf.mxu1  ;;  %2726 = vmatmul.mubr.msk.f32.gmra.mxu0 %vm477_vm0, %v1460_v19 }
 0x172   : > { %v1461_v24 = vmax.f32 %v1383_v13, 0.0  ;;  %v1398_v28 = vadd.f32 %v2659_v23, %v3501_v16 }
 0x173   : > { %v1392_v18 = vpop.f32.mrf.mxu1 }
 0x174   : > { %v1393_v30 = vadd.f32 %v3501_v16, %v1392_v18  ;;  %2728 = vmatprep.mubr.msk.f32.mxu0 %vm477_vm0, %v1461_v24  ;;  %v1464_v20 = vmax.f32 %v1398_v28, 0.0 }
 0x175   : > { %v2662_v31 = vpop.f32.mrf.mxu1  ;;  %2729 = vmatmul.mubr.msk.f32.gmra.mxu0 %vm477_vm0, %v1462_v26 }
 0x176   : > { %v1463_v32 = vmax.f32 %v1393_v30, 0.0  ;;  %v1408_v33 = vadd.f32 %v2662_v31, %v3501_v16 }
 0x177   : > { %v1402_v36 = vpop.f32.mrf.mxu1 }
 0x178   : > { %v1403_v39 = vadd.f32 %v3501_v16, %v1402_v36  ;;  %2731 = vmatprep.mubr.msk.f32.mxu0 %vm477_vm0, %v1463_v32  ;;  %v1466_v43 = vmax.f32 %v1408_v33, 0.0 }
 0x179   : > { %v2665_v40 = vpop.f32.mrf.mxu1  ;;  %2732 = vmatmul.mubr.msk.f32.gmra.mxu0 %vm477_vm0, %v1464_v20 }
 0x17a   : > { %v1465_v42 = vmax.f32 %v1403_v39, 0.0  ;;  %v1418_v46 = vadd.f32 %v2665_v40, %v3501_v16 }
 0x17b   : > { %v1412_v49 = vpop.f32.mrf.mxu1 }
 0x17c   : > { %v1413_v50 = vadd.f32 %v3501_v16, %v1412_v49  ;;  %2734 = vmatprep.mubr.msk.f32.mxu0 %vm477_vm0, %v1465_v42  ;;  %v1468_v55 = vmax.f32 %v1418_v46, 0.0 }
 0x17d   : > { %2735 = vmatmul.mubr.msk.f32.gmra.mxu0 %vm477_vm0, %v1466_v43 }
 0x17e   : > { %v1467_v52 = vmax.f32 %v1413_v50, 0.0 }
 0x180   : > { %2737 = vmatprep.mubr.msk.f32.mxu0 %vm477_vm0, %v1467_v52 }
 0x181   : > { %2738 = vmatmul.mubr.msk.f32.gmra.mxu0 %vm477_vm0, %v1468_v55 }
 0x1e5   : > { %v2670_v56 = vpop.f32.mrf.mxu0 }
 0x1e6   : > { %v1920_v61 = vsel %vm477_vm0, %v2670_v56, -inf }
 0x1e7   : > { %v1680_v57 = vpop.f32.mrf.mxu0 }
 0x1e8   : > { %v1919_v0 = vsel %vm477_vm0, %v1680_v57, -inf }
 0x1e9   : > { %v2673_v58 = vpop.f32.mrf.mxu0 }
 0x1ea   : > { %v1922_v15 = vsel %vm477_vm0, %v2673_v58, -inf }
 0x1eb   : > { %v1690_v59 = vpop.f32.mrf.mxu0 }
 0x1ec   : > { %v1921_v34 = vsel %vm477_vm0, %v1690_v59, -inf }
 0x1ed   : > { %v2676_v60 = vpop.f32.mrf.mxu0 }
 0x1ee   : > { %v1925_v62 = vsel %vm477_vm0, %v2676_v60, -inf }
 0x1ef   : > { %v1926_v16 = vmax.f32 %v1920_v61, %v1925_v62  ;;  %v1700_v63 = vpop.f32.mrf.mxu0 }
 0x1f0   : > { %v1923_v1 = vsel %vm477_vm0, %v1700_v63, -inf }
 0x1f1   : > { %v1924_v2 = vmax.f32 %v1919_v0, %v1923_v1  ;;  %v2679_v9 = vpop.f32.mrf.mxu0 }
 0x1f2   : > { %v1929_v25 = vsel %vm477_vm0, %v2679_v9, -inf }
 0x1f3   : > { %v1930_v27 = vmax.f32 %v1922_v15, %v1929_v25  ;;  %v1710_v29 = vpop.f32.mrf.mxu0 }
 0x1f4   : > { %v1927_v35 = vsel %vm477_vm0, %v1710_v29, -inf }
 0x1f5   : > { %v1928_v37 = vmax.f32 %v1921_v34, %v1927_v35  ;;  %v2682_v38 = vpop.f32.mrf.mxu0 }
 0x1f6   : > { %v1933_v41 = vsel %vm477_vm0, %v2682_v38, -inf }
 0x1f7   : > { %v1934_v44 = vmax.f32 %v1926_v16, %v1933_v41  ;;  %v1720_v45 = vpop.f32.mrf.mxu0 }
 0x1f8   : > { %v1931_v47 = vsel %vm477_vm0, %v1720_v45, -inf }
 0x1f9   : > { %v1932_v48 = vmax.f32 %v1924_v2, %v1931_v47  ;;  %v2685_v51 = vpop.f32.mrf.mxu0 }
 0x1fa   : > { %v1937_v53 = vsel %vm477_vm0, %v2685_v51, -inf }
 0x1fb   : > { %v1938_v54 = vmax.f32 %v1930_v27, %v1937_v53  ;;  %v1730_v5 = vpop.f32.mrf.mxu0 }
 0x1fc   : > { %v1935_v3 = vsel %vm477_vm0, %v1730_v5, -inf }
 0x1fd   : > { %v1936_v4 = vmax.f32 %v1928_v37, %v1935_v3  ;;  %v2688_v6 = vpop.f32.mrf.mxu0 }
 0x1fe   : > { %v1941_v7 = vsel %vm477_vm0, %v2688_v6, -inf }
 0x1ff   : > { %v1942_v10 = vmax.f32 %v1934_v44, %v1941_v7  ;;  %v1740_v8 = vpop.f32.mrf.mxu0 }
 0x200   : > { %v1939_v12 = vsel %vm477_vm0, %v1740_v8, -inf }
 0x201   : > { %v1940_v14 = vmax.f32 %v1932_v48, %v1939_v12  ;;  %v2691_v11 = vpop.f32.mrf.mxu0 }
 0x202   : > { %v1945_v17 = vsel %vm477_vm0, %v2691_v11, -inf }
 0x203   : > { %v1947_v19 = vmax.f32 %v1940_v14, %v1942_v10  ;;  %v1946_v21 = vmax.f32 %v1938_v54, %v1945_v17  ;;  %v1750_v22 = vpop.f32.mrf.mxu0 }
 0x204   : > { %v1943_v13 = vsel %vm477_vm0, %v1750_v22, -inf }
 0x205   : > { %v1944_v23 = vmax.f32 %v1936_v4, %v1943_v13  ;;  %v2694_v24 = vpop.f32.mrf.mxu0 }
 0x206   : > { %v1957_v37 = vsel %vm477_vm0, %v2694_v24, -inf }
 0x207   : > { %v1948_v26 = vmax.f32 %v1944_v23, %v1946_v21  ;;  %v1760_v28 = vpop.f32.mrf.mxu0 }
 0x208   : > { %v1956_v16 = vsel %vm477_vm0, %v1760_v28, -inf }
 0x209   : > { %v3619_v18 = vmax.f32 %v1947_v19, %v1948_v26  ;;  %v2697_v30 = vpop.f32.mrf.mxu0 }
 0x20a   : > { %v1959_v63 = vsel %vm477_vm0, %v2697_v30, -inf }
 0x20b   : > { %v1770_v31 = vpop.f32.mrf.mxu0  ;;  %v1950_v23 = vrot.slane %v3619_v18, 4 }
 0x20c   : > { %v1958_v59 = vsel %vm477_vm0, %v1770_v31, -inf }
 0x20d   : > { %v2700_v32 = vpop.f32.mrf.mxu0 }
 0x20e   : > { %v1962_v2 = vsel %vm477_vm0, %v2700_v32, -inf }
 0x20f   : > { %v1780_v20 = vpop.f32.mrf.mxu0  ;;  %v1963_v45 = vmax.f32 %v1957_v37, %v1962_v2 }
 0x210   : > { %v1960_v60 = vsel %vm477_vm0, %v1780_v20, -inf }
 0x211   : > { %v2703_v33 = vpop.f32.mrf.mxu0  ;;  %v1961_v27 = vmax.f32 %v1956_v16, %v1960_v60  ;;  %v1951_v60 = vmax.f32 %v3619_v18, %v1950_v23 }
 0x212   : > { %v1966_v61 = vsel %vm477_vm0, %v2703_v33, -inf }
 0x213   : > { %v1790_v36 = vpop.f32.mrf.mxu0  ;;  %v1967_v29 = vmax.f32 %v1959_v63, %v1966_v61 }
 0x214   : > { %v1964_v57 = vsel %vm477_vm0, %v1790_v36, -inf }
 0x215   : > { %v2706_v39 = vpop.f32.mrf.mxu0  ;;  %v1965_v0 = vmax.f32 %v1958_v59, %v1964_v57 }
 0x216   : > { %v1970_v38 = vsel %vm477_vm0, %v2706_v39, -inf }
 0x217   : > { %v1800_v40 = vpop.f32.mrf.mxu0  ;;  %v1971_v5 = vmax.f32 %v1963_v45, %v1970_v38 }
 0x218   : > { %v1968_v9 = vsel %vm477_vm0, %v1800_v40, -inf }
 0x219   : > { %v2709_v42 = vpop.f32.mrf.mxu0  ;;  %v1969_v47 = vmax.f32 %v1961_v27, %v1968_v9 }
 0x21a   : > { %v1974_v15 = vsel %vm477_vm0, %v2709_v42, -inf }
 0x21b   : > { %v1810_v43 = vpop.f32.mrf.mxu0  ;;  %v1975_v48 = vmax.f32 %v1967_v29, %v1974_v15  ;;  %v1952_v29 = vrot.slane %v1951_v60, 2 }
 0x21c   : > { %v1972_v62 = vsel %vm477_vm0, %v1810_v43, -inf }
 0x21d   : > { %v2712_v46 = vpop.f32.mrf.mxu0  ;;  %v1973_v34 = vmax.f32 %v1965_v0, %v1972_v62  ;;  %v1953_v38 = vmax.f32 %v1951_v60, %v1952_v29 }
 0x21e   : > { %v1978_v54 = vsel %vm477_vm0, %v2712_v46, -inf }
 0x21f   : > { %v1820_v49 = vpop.f32.mrf.mxu0  ;;  %v1979_v7 = vmax.f32 %v1971_v5, %v1978_v54  ;;  %v2031_v5 = vstv %s2030_s18  ;;  %s2808_s18 = scalar_lea.vmem %s2082_s29, 128 }
 0x220   : > { %v1976_v41 = vsel %vm477_vm0, %v1820_v49, -inf  ;;  %p2809_p9 = scmp.ne.s32.totalorder %s2082_s29, %s2808_s18 }
 0x221   : > { %v2715_v50 = vpop.f32.mrf.mxu0  ;;  %v1977_v3 = vmax.f32 %v1969_v47, %v1976_v41  ;;  %v1954_v47 = vrot.slane %v1953_v38, 1 }
 0x222   : > { %v1982_v44 = vsel %vm477_vm0, %v2715_v50, -inf  ;;  %p2810_p10 = pnand %p2809_p9, %p2969_p5 }
 0x223   : > { %v1830_v52 = vpop.f32.mrf.mxu0  ;;  %v1983_v4 = vmax.f32 %v1975_v48, %v1982_v44  ;;  %v1984_v12 = vmax.f32 %v1977_v3, %v1979_v7  ;;  %v1955_v54 = vmax.f32 %v1953_v38, %v1954_v47 }
 0x224   : > { %v1980_v25 = vsel %vm477_vm0, %v1830_v52, -inf  ;;  %p2811_p12 = pneg %p2810_p10 }
 0x225   : > { %v2718_v55 = vpop.f32.mrf.mxu0  ;;  %v1981_v51 = vmax.f32 %v1973_v34, %v1980_v25 }
 0x226   : > { %v1994_v24 = vsel %vm477_vm0, %v2718_v55, -inf }
 0x227   : > { %v1840_v56 = vpop.f32.mrf.mxu0  ;;  %v1985_v10 = vmax.f32 %v1981_v51, %v1983_v4 }
 0x228   : > { %v1993_v26 = vsel %vm477_vm0, %v1840_v56, -inf }
 0x229   : > { %v2721_v58 = vpop.f32.mrf.mxu0  ;;  %v1986_v11 = vmax.f32 %v1984_v12, %v1985_v10  ;;  %v2032_v10 = vmul.f32 %v2031_v5, %v1955_v54 }
 0x22a   : > { %v1996_v36 = vsel %vm477_vm0, %v2721_v58, -inf }
 0x22b   : > { %v1850_v1 = vpop.f32.mrf.mxu0  ;;  %v1987_v21 = vrot.slane %v1986_v11, 4 }
 0x22c   : > { %v1995_v39 = vsel %vm477_vm0, %v1850_v1, -inf }
 0x22d   : > { %v2724_v35 = vpop.f32.mrf.mxu0  ;;  %v1988_v33 = vmax.f32 %v1986_v11, %v1987_v21 }
 0x22e   : > { %v1999_v30 = vsel %vm477_vm0, %v2724_v35, -inf }
 0x22f   : > { %v1860_v53 = vpop.f32.mrf.mxu0  ;;  %v2000_v52 = vmax.f32 %v1994_v24, %v1999_v30  ;;  %v1989_v2 = vrot.slane %v1988_v33, 2 }
 0x230   : > { %v1997_v13 = vsel %vm477_vm0, %v1860_v53, -inf }
 0x231   : > { %v2727_v6 = vpop.f32.mrf.mxu0  ;;  %v1998_v40 = vmax.f32 %v1993_v26, %v1997_v13  ;;  %v1990_v35 = vmax.f32 %v1988_v33, %v1989_v2 }
 0x232   : > { %v2003_v31 = vsel %vm477_vm0, %v2727_v6, -inf }
 0x233   : > { %v1870_v8 = vpop.f32.mrf.mxu0  ;;  %v2004_v55 = vmax.f32 %v1996_v36, %v2003_v31  ;;  %v1991_v44 = vrot.slane %v1990_v35, 1 }
 0x234   : > { %v2001_v32 = vsel %vm477_vm0, %v1870_v8, -inf  ;;  %v2040_v8 = vstv %s2037_s25  ;;  %s2814_s25 = scalar_lea.vmem %s2813_s21, 256 }
 0x235   : > { %v2730_v14 = vpop.f32.mrf.mxu0  ;;  %v2002_v56 = vmax.f32 %v1995_v39, %v2001_v32  ;;  %v1992_v51 = vmax.f32 %v1990_v35, %v1991_v44  ;;  %p2816_p0 = scmp.lt.s32.totalorder %s2814_s25, %s2808_s18 }
 0x236   : > { %v2007_v43 = vsel %vm477_vm0, %v2730_v14, -inf }
 0x237   : > { %v1880_v17 = vpop.f32.mrf.mxu0  ;;  %v2008_v62 = vmax.f32 %v2000_v52, %v2007_v43  ;;  %v2033_v4 = vmul.f32 %v2031_v5, %v1992_v51  ;;  %v2038_v6 = vadd.f32 %v1992_v51, %v1955_v54  ;;  %p2817_p1 = por %p2816_p0, %p2815_p13 }
 0x238   : > { %v2005_v20 = vsel %vm477_vm0, %v1880_v17, -inf }
 0x239   : > { %v2733_v19 = vpop.f32.mrf.mxu0  ;;  %v2006_v57 = vmax.f32 %v1998_v40, %v2005_v20  ;;  %v2043_v11 = vsel %vm2042_vm1, %v2032_v10, %v2033_v4  ;;  %p2818_p2 = pnand %p2817_p1, %p2811_p12 }
 0x23a   : > { %v2011_v46 = vsel %vm477_vm0, %v2733_v19, -inf }
 0x23b   : > { %v1890_v22 = vpop.f32.mrf.mxu0  ;;  %v2012_v16 = vmax.f32 %v2004_v55, %v2011_v46 }
 0x23c   : > { %v2009_v49 = vsel %vm477_vm0, %v1890_v22, -inf }
 0x23d   : > { %v2736_v28 = vpop.f32.mrf.mxu0  ;;  %v2010_v63 = vmax.f32 %v2002_v56, %v2009_v49 }
 0x23e   : > { %v2015_v58 = vsel %vm477_vm0, %v2736_v28, -inf }
 0x23f   : > { %v1900_v42 = vpop.f32.mrf.mxu0  ;;  %v2016_v15 = vmax.f32 %v2008_v62, %v2015_v58 }
 0x240   : > { %v2013_v50 = vsel %vm477_vm0, %v1900_v42, -inf }
 0x241   : > { %v2739_v59 = vpop.f32.mrf.mxu0  ;;  %v2014_v0 = vmax.f32 %v2006_v57, %v2013_v50 }
 0x242   : > { %v2019_v61 = vsel %vm477_vm0, %v2739_v59, -inf }
 0x243   : > { %v1910_v1 = vpop.f32.mrf.mxu0  ;;  %v2020_v25 = vmax.f32 %v2012_v16, %v2019_v61  ;;  %v2021_v34 = vmax.f32 %v2014_v0, %v2016_v15 }
 0x244   : > { %v2017_v9 = vsel %vm477_vm0, %v1910_v1, -inf }
 0x245   : > { %v2018_v27 = vmax.f32 %v2010_v63, %v2017_v9 }
 0x247   : > { %v2022_v18 = vmax.f32 %v2018_v27, %v2020_v25 }
 0x249   : > { %v2023_v37 = vmax.f32 %v2021_v34, %v2022_v18 }
 0x24b   : > { %v2024_v41 = vrot.slane %v2023_v37, 4 }
 0x24d   : > { %v2025_v45 = vmax.f32 %v2023_v37, %v2024_v41 }
 0x24f   : > { %v2026_v48 = vrot.slane %v2025_v45, 2 }
 0x251   : > { %v2027_v53 = vmax.f32 %v2025_v45, %v2026_v48 }
 0x253   : > { %v2028_v3 = vrot.slane %v2027_v53, 1 }
 0x255   : > { %v2029_v7 = vmax.f32 %v2027_v53, %v2028_v3 }
 0x257   : > { %v2034_v12 = vmul.f32 %v2031_v5, %v2029_v7  ;;  %v2039_v14 = vadd.f32 %v2038_v6, %v2029_v7 }
 0x259   : > { %v2041_v17 = vmul.f32 %v2040_v8, %v2039_v14  ;;  %v2045_v19 = vsel %vm2044_vm2, %v2043_v11, %v2034_v12 }
 0x25b   : > { %v2047_v21 = vsel %vm2046_vm3, %v2045_v19, %v2041_v17 }
 0x25c   : > { %v2049_v22 = vsel %vm2048_vm4, %v2047_v21, 0.0 }
 0x25d   : > { %2050 = vst.msk [vmem:[%s381_s28] sm:$0xff] %vm477_vm0, %v2049_v22 }
 0x25e   : > { %2821 = shalt.err (!%p2818_p2)
}
 0x25f   : > { %s2822_s27 = scalar_lea.hbm %s3662_s26, 128  ;;  %s2826_s30 = scalar_lea.hbm %s3710_s10, 256 }
 0x260   : > { %p2823_p3 = scmp.ne.s32.totalorder %s3662_s26, %s2822_s27  ;;  %p2827_p8 = scmp.lt.s32.totalorder %s3662_s26, %s3710_s10 }
 0x261   : > { %p2828_p11 = scmp.lt.s32.totalorder %s2826_s30, %s2822_s27 }
 0x262   : > { %p2824_p4 = pnand %p2823_p3, %p2969_p5 }
 0x263   : > { %p2829_p9 = por %p2828_p11, %p2827_p8 }
 0x264   : > { %p2825_p7 = pneg %p2824_p4 }
 0x266   : > { %p2830_p10 = pnand %p2829_p9, %p2825_p7 }
 0x268   : > { %2833 = shalt.err (!%p2830_p10)
}
 0x269   : > { %2747 = dma.vmem_to_hbm [thread:$0]  (%p2969_p5), %s2082_s29, 128, %s3662_s26, %s2062_s12  }
 0x26a PF: > { %p2759_p12 = scmp.ge.s32.totalorder %s2872_s16, 2  ;;  %s2109_s18 = sand.u32 1, %s2860_s13  }
 0x26b   : > { %s2110_s21 = scalar_lea.sflag [#allocation3], %s2109_s18 }
 0x26c   : > { %p2754_p13 = pnand %p2759_p12, %p2973_p6 }
 0x26e   : > { %p2755_p0 = pneg %p2754_p13 }
 0x270   : > { %2855 = dma.done.wait (%p2755_p0), %s2110_s21, 128  }
 0x271   : > { %2857 = vsyncadd (%p2755_p0), %s2110_s21, 4294967168  ;;  %p22_p1 = scmp.ge.s32.totalorder %s2956_s19, 4   ;;  %s3714_s13 = smov %s2864_s14 }
 0x272   : > { %s3715_s14 = smov %s2868_s15  ;;  %s3716_s15 = smov %s2967_s22 }
 0x273   : > { %s3717_s16 = smov %s2956_s19  ;;  %24 = sbr.rel (!%p22_p1) target bundleno = 4 (0x4), region = 116 }
 0x278   :  { %2115 = vsyncpa [#allocation3], 1 }
 0x279   :  { %2117 = vsyncpa [#allocation3 + $0x1], 1 }
 0x27a   :  { %2118 = vsyncpa [#allocation4], 1 }
 0x27b   :  { %2120 = vsyncpa [#allocation4 + $0x1], 1 }

</bundles_post_ra>
